<compile_context>
chip_gen: v7x
topology: tpu7x:2x2x1
jax: 0.10.0
libtpu: 0.0.40
codegen_flags: <defaults>
</compile_context>

<pallas_src>
import jax
import jax.numpy as jnp
from jax import lax
from jax.experimental import pallas as pl
from jax.experimental.pallas import tpu as pltpu


# -----------------------------------------------------------------------------
# Kernel
# -----------------------------------------------------------------------------
def gcnn_split_kernel(state_ref, left_ref, adj_ref, sc_r_ref, sc_c_ref,
                      w1_ref, b1_ref, lna_ref, lnb_ref,
                      wqk_ref, bqk_ref, wv_ref, bv_ref,
                      wo_ref, bo_ref, w2_ref, b2_ref,
                      out_ref):
    BT, N, D = state_ref.shape
    M = BT * N
    f32 = jnp.float32
    bf16 = jnp.bfloat16

    # ---- state = self.linear(state); batch folded into M = BT*N rows --------
    x = state_ref[...].reshape(M, D)                                   # bf16
    s1 = jnp.dot(x, w1_ref[...], preferred_element_type=f32) + b1_ref[...]

    # ---- graph aggregation: D_r^-1/2 @ A @ D_c^-1/2 @ left -------------------
    # Column scale folded into `left` rows in f32; row scale applied to the
    # (N, D) matmul output.  The bf16 adjacency block feeds the MXU untouched
    # (no f32 (N, N) temp, no N^2 multiply / recast).
    left_s = (left_ref[...].astype(f32) * sc_c_ref[...]).astype(bf16)  # (BT,N,D)
    agg = jnp.einsum('bij,bjd->bid', adj_ref[...], left_s,
                     preferred_element_type=f32)                       # (BT,N,D) f32
    agg = (sc_r_ref[...] * agg).reshape(M, D)

    # ---- SublayerConnection pre-norm LayerNorm -------------------------------
    # a*(x-mean)/(std_unbiased+eps)+b.  Exact reciprocal here (this scale feeds
    # every downstream matmul); approx reciprocal only on the gate denominator.
    mean = jnp.mean(s1, axis=-1, keepdims=True)
    var_unbiased = jnp.sum((s1 - mean) ** 2, axis=-1, keepdims=True) / (D - 1)
    inv_std = pl.reciprocal(jnp.sqrt(var_unbiased) + 1e-6, approx=False)
    ns = lna_ref[...] * (s1 - mean) * inv_std + lnb_ref[...]

    # ---- MultiHeadedCombination(ns, ns, agg) ---------------------------------
    # Q/K fused into one (D, 2D) matmul; legal because D % 128 == 0 so the
    # slice at column D lands on a vreg lane boundary (no relayout).
    qk = (jnp.dot(ns.astype(bf16), wqk_ref[...], preferred_element_type=f32)
          + bqk_ref[...])                                              # (M, 2D)
    q = qk[:, :D]
    k = qk[:, D:]
    v = (jnp.dot(agg.astype(bf16), wv_ref[...], preferred_element_type=f32)
         + bv_ref[...])

    # element-wise softmax gate over the three candidates
    m = jnp.maximum(jnp.maximum(q, k), v)
    eq = jnp.exp(q - m)
    ek = jnp.exp(k - m)
    ev = jnp.exp(v - m)
    comb = (eq * q + ek * k + ev * v) * pl.reciprocal(eq + ek + ev, approx=True)

    com = (jnp.dot(comb.astype(bf16), wo_ref[...], preferred_element_type=f32)
           + bo_ref[...])

    # ---- residual + second Linear --------------------------------------------
    s2 = s1 + com
    out = (jnp.dot(s2.astype(bf16), w2_ref[...], preferred_element_type=f32)
           + b2_ref[...])
    out_ref[...] = out.reshape(BT, N, D).astype(out_ref.dtype)


# -----------------------------------------------------------------------------
# Generation-aware sizing helpers
# -----------------------------------------------------------------------------
def _vmem_capacity_bytes():
    try:
        info = pltpu.get_tpu_info()
        cap = getattr(info, "vmem_capacity_bytes", None)
        if cap:
            return int(cap)
    except Exception:
        pass
    return 64 << 20          # conservative default (v7x per-TensorCore VMEM)


def _vmem_budget_bytes(capacity):
    if capacity <= (64 << 20):
        # v7x-class (64 MiB/TC): leave headroom for Mosaic internal scratch.
        return 52 << 20
    # v5e / v6e-class (128 MiB): allow ~100 MiB so tiles can grow.
    return int(min(capacity - (24 << 20), 104 << 20))


def _kernel_vmem_bytes(bt, N, D, out_itemsize, weight_bufs=2):
    """Approximate VMEM need: pipelined IO blocks + weight buffers + live f32 temps."""
    M = bt * N
    io = 2 * (2 * bt * N * D * 2          # state + left blocks (bf16), double-buffered
              + bt * N * N * 2            # adjacency block (bf16)
              + 2 * bt * N * 4            # scale_r / scale_c blocks (f32)
              + bt * N * D * out_itemsize)
    weights = weight_bufs * (6 * D * D * 2 + 8 * D * 4)   # bf16 weights + f32 biases/LN
    temps = 14 * M * D * 4                # s1/agg/ns/qk/v/gate/comb/s2/out live f32 tiles
    return io + weights + temps


def _pick_block_b(B, N, D, out_itemsize, budget, dual_tc, row_target=1024):
    """Largest batch block whose VMEM footprint fits the per-generation budget,
    softly capped at ~row_target fused-matmul rows; on dual-TensorCore parts
    keep an even grid of >= 4 (else >= 2) steps so the 'parallel' axis shards
    across both TCs with something left to pipeline behind compute."""
    cands = [b for b in range(1, B + 1) if B % b == 0]
    fits = [b for b in cands if _kernel_vmem_bytes(b, N, D, out_itemsize) <= budget]
    if not fits:
        fits = [1]
    good = [b for b in fits if b * N <= row_target] or [min(fits)]
    if dual_tc and B >= 2:
        for min_steps in (4, 2):
            pref = [b for b in good if (B // b) >= min_steps and (B // b) % 2 == 0]
            if pref:
                return max(pref)
    return max(good)


# -----------------------------------------------------------------------------
# Wrapper
# -----------------------------------------------------------------------------
def gcnn_split(state, left, inputad, params, *, block_b=None, out_dtype=None):
    B, N, D = state.shape
    if out_dtype is None:
        out_dtype = state.dtype          # pass jnp.bfloat16 to halve writeback DMA
    out_itemsize = jnp.dtype(out_dtype).itemsize

    # Lane/sublane-friendly shapes: the kernel stores (.., N, D) tiles, so D
    # must be a lane multiple (unmasked vst) and N a sublane multiple.
    assert D % 128 == 0, (
        "gcnn_split requires dmodel % 128 == 0 (pad dmodel on the host); at "
        "smaller D every store is a masked partial vst and the MXU runs mostly "
        "on padding — use the plain XLA path instead.")
    assert N % 8 == 0, "node count N must be a multiple of 8 (sublane alignment)"

    capacity = _vmem_capacity_bytes()
    budget = _vmem_budget_bytes(capacity)
    dual_tc = capacity <= (64 << 20)     # v7x-class heuristic (2 TensorCores/chip)
    if block_b is None:
        block_b = _pick_block_b(B, N, D, out_itemsize, budget, dual_tc)
    assert B % block_b == 0, "batch must be divisible by the batch block"
    grid = (B // block_b,)

    # bf16 MXU operands; adjacency is {0,1} so bf16 is exact and halves its DMA.
    state_b = state.astype(jnp.bfloat16)
    left_b = left.astype(jnp.bfloat16)
    adj_b = inputad.astype(jnp.bfloat16)

    # Per-node degree scales (f32).  Computed here where the reductions fuse
    # with the f32->bf16 adjacency cast above (adjacency streamed once); the
    # kernel keeps zero non-MXU N^2 work and no f32 N^2 temp.
    inputad_f32 = inputad.astype(jnp.float32)
    scale_r = lax.rsqrt(jnp.maximum(jnp.sum(inputad_f32, -1, keepdims=True), 1e-6))
    scale_c = lax.rsqrt(jnp.maximum(jnp.sum(inputad_f32, -2, keepdims=True), 1e-6))
    scale_c = jnp.swapaxes(scale_c, -1, -2)           # (B, N, 1): scales rows of `left`

    def wt(w):   # pre-transposed (in, out) bf16 weight: no in-kernel .T
        return jnp.asarray(w).T.astype(jnp.bfloat16)

    def row(v):  # (1, D) f32 row vector
        return jnp.asarray(v, jnp.float32).reshape(1, -1)

    w1 = wt(params["w1"])
    wv = wt(params["wv"])
    wo = wt(params["wo"])
    w2 = wt(params["w2"])
    wqk = jnp.concatenate([wt(params["wq"]), wt(params["wk"])], axis=1)    # (D, 2D)
    bqk = jnp.concatenate([row(params["bq"]), row(params["bk"])], axis=1)  # (1, 2D)

    x_spec = pl.BlockSpec((block_b, N, D), lambda b: (b, 0, 0))
    a_spec = pl.BlockSpec((block_b, N, N), lambda b: (b, 0, 0))
    s_spec = pl.BlockSpec((block_b, N, 1), lambda b: (b, 0, 0))

    param_args = (
        w1, row(params["b1"]),
        row(params["ln_a"]), row(params["ln_b"]),
        wqk, bqk,
        wv, row(params["bv"]),
        wo, row(params["bo"]),
        w2, row(params["b2"]),
    )

    # Grid-invariant parameter blocks (constant index_map => DMA'd once).  When
    # the weights are large enough to matter (large D vs v7x's 64 MiB VMEM),
    # drop them to a single pipeline buffer; at small D the extra buffer is
    # noise and the default double-buffering is kept.
    weight_bytes = sum(int(a.size) * a.dtype.itemsize for a in param_args)
    single_buffer = weight_bytes > (2 << 20)

    def const_spec(shape):
        if single_buffer:
            return pl.BlockSpec(shape, lambda b: (0,) * len(shape),
                                pipeline_mode=pl.Buffered(1))
        return pl.BlockSpec(shape, lambda b: (0,) * len(shape))

    in_specs = ([x_spec, x_spec, a_spec, s_spec, s_spec]
                + [const_spec(a.shape) for a in param_args])

    need = _kernel_vmem_bytes(block_b, N, D, out_itemsize,
                              weight_bufs=1 if single_buffer else 2)
    vmem_limit = int(max(min(need + (16 << 20), budget), 32 << 20))

    return pl.pallas_call(
        gcnn_split_kernel,
        out_shape=jax.ShapeDtypeStruct((B, N, D), out_dtype),
        grid=grid,
        in_specs=in_specs,
        out_specs=x_spec,
        compiler_params=pltpu.CompilerParams(
            dimension_semantics=("parallel",),
            vmem_limit_bytes=vmem_limit),
    )(state_b, left_b, adj_b, scale_r, scale_c, *param_args)


# -----------------------------------------------------------------------------
# Pure-JAX f32 reference (eval mode, dropout = identity) and demo
# -----------------------------------------------------------------------------
def reference(state, left, inputad, p):
    D = state.shape[-1]
    s1 = state @ p["w1"].T + p["b1"]
    deg_r = jnp.maximum(inputad.sum(-1, keepdims=True), 1e-6)
    deg_c = jnp.maximum(inputad.sum(-2, keepdims=True), 1e-6)
    a_hat = (1.0 / jnp.sqrt(deg_r)) * inputad * (1.0 / jnp.sqrt(deg_c))
    mean = s1.mean(-1, keepdims=True)
    std = jnp.sqrt(((s1 - mean) ** 2).sum(-1, keepdims=True) / (D - 1))
    ns = p["ln_a"] * (s1 - mean) / (std + 1e-6) + p["ln_b"]
    agg = a_hat @ left
    q = ns @ p["wq"].T + p["bq"]
    k = ns @ p["wk"].T + p["bk"]
    v = agg @ p["wv"].T + p["bv"]
    m = jnp.maximum(jnp.maximum(q, k), v)
    eq, ek, ev = jnp.exp(q - m), jnp.exp(k - m), jnp.exp(v - m)
    comb = (eq * q + ek * k + ev * v) / (eq + ek + ev)
    com = comb @ p["wo"].T + p["bo"]
    s2 = s1 + com
    return s2 @ p["w2"].T + p["b2"]


def init_params(key, dmodel):
    names = ["w1", "wq", "wk", "wv", "wo", "w2"]
    keys = jax.random.split(key, len(names))
    p = {}
    for n, k in zip(names, keys):
        p[n] = (0.02 * jax.random.normal(k, (dmodel, dmodel))).astype(jnp.float32)
    for n in ["b1", "bq", "bk", "bv", "bo", "b2", "ln_b"]:
        p[n] = jnp.zeros((dmodel,), jnp.float32)
    p["ln_a"] = jnp.ones((dmodel,), jnp.float32)
    return p


if __name__ == "__main__":
    # batch, nodes, dmodel (heads=8 -> d_k=16, folded away by the element-wise
    # gate).  D = 128 keeps all stores lane-dense and the MXU unpadded in D.
    B, N, D = 16, 16, 128

    key = jax.random.PRNGKey(0)
    k_state, k_left, k_adj, k_par = jax.random.split(key, 4)

    state = jax.random.normal(k_state, (B, N, D), dtype=jnp.float32)
    left = jax.random.normal(k_left, (B, N, D), dtype=jnp.float32)
    # binary adjacency (non-negative; may contain empty rows -> clamp path)
    inputad = (jax.random.uniform(k_adj, (B, N, N)) > 0.6).astype(jnp.float32)

    params = init_params(k_par, D)

    out = jax.jit(gcnn_split)(state, left, inputad, params)
    out = jax.block_until_ready(out)

    ref = reference(state, left, inputad, params)
    assert out.shape == (B, N, D)
    max_err = float(jnp.max(jnp.abs(out - ref)))
    # bf16 MXU operands + one EUP approx reciprocal => small absolute error.
    assert jnp.allclose(out, ref, atol=2e-2, rtol=5e-2), (
        f"mismatch vs JAX reference (max abs err {max_err})")

    print("KERNEL_OK")
</pallas_src>

<mosaic_0001>
module attributes {stable_mosaic.version = 11 : i64} {
  func.func @gcnn_split_kernel(%arg0: i32, %arg1: memref<4x16x128xbf16, #tpu.memory_space<vmem>>, %arg2: memref<4x16x128xbf16, #tpu.memory_space<vmem>>, %arg3: memref<4x16x16xbf16, #tpu.memory_space<vmem>>, %arg4: memref<4x16x1xf32, #tpu.memory_space<vmem>>, %arg5: memref<4x16x1xf32, #tpu.memory_space<vmem>>, %arg6: memref<128x128xbf16, #tpu.memory_space<vmem>>, %arg7: memref<1x128xf32, #tpu.memory_space<vmem>>, %arg8: memref<1x128xf32, #tpu.memory_space<vmem>>, %arg9: memref<1x128xf32, #tpu.memory_space<vmem>>, %arg10: memref<128x256xbf16, #tpu.memory_space<vmem>>, %arg11: memref<1x256xf32, #tpu.memory_space<vmem>>, %arg12: memref<128x128xbf16, #tpu.memory_space<vmem>>, %arg13: memref<1x128xf32, #tpu.memory_space<vmem>>, %arg14: memref<128x128xbf16, #tpu.memory_space<vmem>>, %arg15: memref<1x128xf32, #tpu.memory_space<vmem>>, %arg16: memref<128x128xbf16, #tpu.memory_space<vmem>>, %arg17: memref<1x128xf32, #tpu.memory_space<vmem>>, %arg18: memref<4x16x128xf32, #tpu.memory_space<vmem>>) attributes {dimension_semantics = [#tpu.dimension_semantics<parallel>], iteration_bounds = array<i64: 4>, scalar_prefetch = 0 : i64, scratch_operands = 0 : i64, tpu.core_type = #tpu.core_type<tc>, window_params = [{transform_indices = @transform_0, window_bounds = array<i64: 4, 16, 128>}, {transform_indices = @transform_1, window_bounds = array<i64: 4, 16, 128>}, {transform_indices = @transform_2, window_bounds = array<i64: 4, 16, 16>}, {transform_indices = @transform_3, window_bounds = array<i64: 4, 16, 1>}, {transform_indices = @transform_4, window_bounds = array<i64: 4, 16, 1>}, {pipeline_mode = #tpu.pipeline_mode<synchronous>, transform_indices = @transform_5, window_bounds = array<i64: 128, 128>}, {pipeline_mode = #tpu.pipeline_mode<synchronous>, transform_indices = @transform_6, window_bounds = array<i64: 1, 128>}, {pipeline_mode = #tpu.pipeline_mode<synchronous>, transform_indices = @transform_7, window_bounds = array<i64: 1, 128>}, {pipeline_mode = #tpu.pipeline_mode<synchronous>, transform_indices = @transform_8, window_bounds = array<i64: 1, 128>}, {pipeline_mode = #tpu.pipeline_mode<synchronous>, transform_indices = @transform_9, window_bounds = array<i64: 128, 256>}, {pipeline_mode = #tpu.pipeline_mode<synchronous>, transform_indices = @transform_10, window_bounds = array<i64: 1, 256>}, {pipeline_mode = #tpu.pipeline_mode<synchronous>, transform_indices = @transform_11, window_bounds = array<i64: 128, 128>}, {pipeline_mode = #tpu.pipeline_mode<synchronous>, transform_indices = @transform_12, window_bounds = array<i64: 1, 128>}, {pipeline_mode = #tpu.pipeline_mode<synchronous>, transform_indices = @transform_13, window_bounds = array<i64: 128, 128>}, {pipeline_mode = #tpu.pipeline_mode<synchronous>, transform_indices = @transform_14, window_bounds = array<i64: 1, 128>}, {pipeline_mode = #tpu.pipeline_mode<synchronous>, transform_indices = @transform_15, window_bounds = array<i64: 128, 128>}, {pipeline_mode = #tpu.pipeline_mode<synchronous>, transform_indices = @transform_16, window_bounds = array<i64: 1, 128>}, {transform_indices = @transform_17, window_bounds = array<i64: 4, 16, 128>}]} {
    %c0 = arith.constant 0 : index
    %c0_0 = arith.constant 0 : index
    %c0_1 = arith.constant 0 : index
    %0 = vector.load %arg1[%c0, %c0_0, %c0_1] : memref<4x16x128xbf16, #tpu.memory_space<vmem>>, vector<4x16x128xbf16>
    %1 = vector.shape_cast %0 : vector<4x16x128xbf16> to vector<64x128xbf16>
    %c0_2 = arith.constant 0 : index
    %c0_3 = arith.constant 0 : index
    %2 = vector.load %arg6[%c0_2, %c0_3] : memref<128x128xbf16, #tpu.memory_space<vmem>>, vector<128x128xbf16>
    %cst = arith.constant dense<0.000000e+00> : vector<64x128xf32>
    %3 = tpu.matmul %1, %2, %cst {dimension_numbers = #tpu.dot_dimension_numbers<[1], [0], [0], [1], [0, 0, 1, 1], [], []>} : vector<64x128xbf16>, vector<128x128xbf16>, vector<64x128xf32> -> vector<64x128xf32>
    %c0_4 = arith.constant 0 : index
    %c0_5 = arith.constant 0 : index
    %4 = vector.load %arg7[%c0_4, %c0_5] : memref<1x128xf32, #tpu.memory_space<vmem>>, vector<1x128xf32>
    %5 = vector.broadcast %4 : vector<1x128xf32> to vector<64x128xf32>
    %6 = arith.addf %3, %5 : vector<64x128xf32>
    %c0_6 = arith.constant 0 : index
    %c0_7 = arith.constant 0 : index
    %c0_8 = arith.constant 0 : index
    %7 = vector.load %arg2[%c0_6, %c0_7, %c0_8] : memref<4x16x128xbf16, #tpu.memory_space<vmem>>, vector<4x16x128xbf16>
    %8 = arith.extf %7 : vector<4x16x128xbf16> to vector<4x16x128xf32>
    %c0_9 = arith.constant 0 : index
    %c0_10 = arith.constant 0 : index
    %c0_11 = arith.constant 0 : index
    %9 = vector.load %arg5[%c0_9, %c0_10, %c0_11] : memref<4x16x1xf32, #tpu.memory_space<vmem>>, vector<4x16x1xf32>
    %10 = vector.broadcast %9 : vector<4x16x1xf32> to vector<4x16x128xf32>
    %11 = arith.mulf %8, %10 : vector<4x16x128xf32>
    %12 = arith.truncf %11 : vector<4x16x128xf32> to vector<4x16x128xbf16>
    %c0_12 = arith.constant 0 : index
    %c0_13 = arith.constant 0 : index
    %c0_14 = arith.constant 0 : index
    %13 = vector.load %arg3[%c0_12, %c0_13, %c0_14] : memref<4x16x16xbf16, #tpu.memory_space<vmem>>, vector<4x16x16xbf16>
    "tpu.trace_start"() <{level = 10 : i32, message = "bij,bjd->bid"}> : () -> ()
    %cst_15 = arith.constant dense<0.000000e+00> : vector<4x16x128xf32>
    %14 = tpu.matmul %13, %12, %cst_15 {dimension_numbers = #tpu.dot_dimension_numbers<[2], [1], [1], [2], [0, 0, 0, 1, 1, 2], [0], [0]>} : vector<4x16x16xbf16>, vector<4x16x128xbf16>, vector<4x16x128xf32> -> vector<4x16x128xf32>
    "tpu.trace_stop"() : () -> ()
    %c0_16 = arith.constant 0 : index
    %c0_17 = arith.constant 0 : index
    %c0_18 = arith.constant 0 : index
    %15 = vector.load %arg4[%c0_16, %c0_17, %c0_18] : memref<4x16x1xf32, #tpu.memory_space<vmem>>, vector<4x16x1xf32>
    %16 = vector.broadcast %15 : vector<4x16x1xf32> to vector<4x16x128xf32>
    %17 = arith.mulf %16, %14 : vector<4x16x128xf32>
    %18 = vector.shape_cast %17 : vector<4x16x128xf32> to vector<64x128xf32>
    %cst_19 = arith.constant dense<0.000000e+00> : vector<64xf32>
    %19 = vector.multi_reduction <add>, %6, %cst_19 [1] : vector<64x128xf32> to vector<64xf32>
    %20 = vector.shape_cast %19 : vector<64xf32> to vector<64x1xf32>
    %cst_20 = arith.constant 1.280000e+02 : f32
    %21 = vector.broadcast %cst_20 : f32 to vector<64x1xf32>
    %22 = arith.divf %20, %21 : vector<64x1xf32>
    %23 = vector.broadcast %22 : vector<64x1xf32> to vector<64x128xf32>
    %24 = arith.subf %6, %23 : vector<64x128xf32>
    %25 = arith.mulf %24, %24 : vector<64x128xf32>
    %cst_21 = arith.constant dense<0.000000e+00> : vector<64xf32>
    %26 = vector.multi_reduction <add>, %25, %cst_21 [1] : vector<64x128xf32> to vector<64xf32>
    %27 = vector.shape_cast %26 : vector<64xf32> to vector<64x1xf32>
    %cst_22 = arith.constant 1.270000e+02 : f32
    %28 = vector.broadcast %cst_22 : f32 to vector<64x1xf32>
    %29 = arith.divf %27, %28 : vector<64x1xf32>
    %30 = math.sqrt %29 : vector<64x1xf32>
    %cst_23 = arith.constant 9.99999997E-7 : f32
    %31 = vector.broadcast %cst_23 : f32 to vector<64x1xf32>
    %32 = arith.addf %30, %31 : vector<64x1xf32>
    %33 = tpu.reciprocal %32 : vector<64x1xf32> -> vector<64x1xf32>
    %c0_24 = arith.constant 0 : index
    %c0_25 = arith.constant 0 : index
    %34 = vector.load %arg8[%c0_24, %c0_25] : memref<1x128xf32, #tpu.memory_space<vmem>>, vector<1x128xf32>
    %35 = vector.broadcast %22 : vector<64x1xf32> to vector<64x128xf32>
    %36 = arith.subf %6, %35 : vector<64x128xf32>
    %37 = vector.broadcast %34 : vector<1x128xf32> to vector<64x128xf32>
    %38 = arith.mulf %37, %36 : vector<64x128xf32>
    %39 = vector.broadcast %33 : vector<64x1xf32> to vector<64x128xf32>
    %40 = arith.mulf %38, %39 : vector<64x128xf32>
    %c0_26 = arith.constant 0 : index
    %c0_27 = arith.constant 0 : index
    %41 = vector.load %arg9[%c0_26, %c0_27] : memref<1x128xf32, #tpu.memory_space<vmem>>, vector<1x128xf32>
    %42 = vector.broadcast %41 : vector<1x128xf32> to vector<64x128xf32>
    %43 = arith.addf %40, %42 : vector<64x128xf32>
    %44 = arith.truncf %43 : vector<64x128xf32> to vector<64x128xbf16>
    %c0_28 = arith.constant 0 : index
    %c0_29 = arith.constant 0 : index
    %45 = vector.load %arg10[%c0_28, %c0_29] : memref<128x256xbf16, #tpu.memory_space<vmem>>, vector<128x256xbf16>
    %cst_30 = arith.constant dense<0.000000e+00> : vector<64x256xf32>
    %46 = tpu.matmul %44, %45, %cst_30 {dimension_numbers = #tpu.dot_dimension_numbers<[1], [0], [0], [1], [0, 0, 1, 1], [], []>} : vector<64x128xbf16>, vector<128x256xbf16>, vector<64x256xf32> -> vector<64x256xf32>
    %c0_31 = arith.constant 0 : index
    %c0_32 = arith.constant 0 : index
    %47 = vector.load %arg11[%c0_31, %c0_32] : memref<1x256xf32, #tpu.memory_space<vmem>>, vector<1x256xf32>
    %48 = vector.broadcast %47 : vector<1x256xf32> to vector<64x256xf32>
    %49 = arith.addf %46, %48 : vector<64x256xf32>
    %50 = vector.extract_strided_slice %49 {offsets = [0, 0], sizes = [64, 128], strides = [1, 1]} : vector<64x256xf32> to vector<64x128xf32>
    %51 = vector.extract_strided_slice %49 {offsets = [0, 128], sizes = [64, 128], strides = [1, 1]} : vector<64x256xf32> to vector<64x128xf32>
    %52 = arith.truncf %18 : vector<64x128xf32> to vector<64x128xbf16>
    %c0_33 = arith.constant 0 : index
    %c0_34 = arith.constant 0 : index
    %53 = vector.load %arg12[%c0_33, %c0_34] : memref<128x128xbf16, #tpu.memory_space<vmem>>, vector<128x128xbf16>
    %cst_35 = arith.constant dense<0.000000e+00> : vector<64x128xf32>
    %54 = tpu.matmul %52, %53, %cst_35 {dimension_numbers = #tpu.dot_dimension_numbers<[1], [0], [0], [1], [0, 0, 1, 1], [], []>} : vector<64x128xbf16>, vector<128x128xbf16>, vector<64x128xf32> -> vector<64x128xf32>
    %c0_36 = arith.constant 0 : index
    %c0_37 = arith.constant 0 : index
    %55 = vector.load %arg13[%c0_36, %c0_37] : memref<1x128xf32, #tpu.memory_space<vmem>>, vector<1x128xf32>
    %56 = vector.broadcast %55 : vector<1x128xf32> to vector<64x128xf32>
    %57 = arith.addf %54, %56 : vector<64x128xf32>
    %58 = arith.maximumf %50, %51 : vector<64x128xf32>
    %59 = arith.maximumf %58, %57 : vector<64x128xf32>
    %60 = arith.subf %50, %59 : vector<64x128xf32>
    %61 = math.exp %60 : vector<64x128xf32>
    %62 = arith.subf %51, %59 : vector<64x128xf32>
    %63 = math.exp %62 : vector<64x128xf32>
    %64 = arith.subf %57, %59 : vector<64x128xf32>
    %65 = math.exp %64 : vector<64x128xf32>
    %66 = arith.mulf %61, %50 : vector<64x128xf32>
    %67 = arith.mulf %63, %51 : vector<64x128xf32>
    %68 = arith.addf %66, %67 : vector<64x128xf32>
    %69 = arith.mulf %65, %57 : vector<64x128xf32>
    %70 = arith.addf %68, %69 : vector<64x128xf32>
    %71 = arith.addf %61, %63 : vector<64x128xf32>
    %72 = arith.addf %71, %65 : vector<64x128xf32>
    %73 = tpu.reciprocal %72 {approx = true} : vector<64x128xf32> -> vector<64x128xf32>
    %74 = arith.mulf %70, %73 : vector<64x128xf32>
    %75 = arith.truncf %74 : vector<64x128xf32> to vector<64x128xbf16>
    %c0_38 = arith.constant 0 : index
    %c0_39 = arith.constant 0 : index
    %76 = vector.load %arg14[%c0_38, %c0_39] : memref<128x128xbf16, #tpu.memory_space<vmem>>, vector<128x128xbf16>
    %cst_40 = arith.constant dense<0.000000e+00> : vector<64x128xf32>
    %77 = tpu.matmul %75, %76, %cst_40 {dimension_numbers = #tpu.dot_dimension_numbers<[1], [0], [0], [1], [0, 0, 1, 1], [], []>} : vector<64x128xbf16>, vector<128x128xbf16>, vector<64x128xf32> -> vector<64x128xf32>
    %c0_41 = arith.constant 0 : index
    %c0_42 = arith.constant 0 : index
    %78 = vector.load %arg15[%c0_41, %c0_42] : memref<1x128xf32, #tpu.memory_space<vmem>>, vector<1x128xf32>
    %79 = vector.broadcast %78 : vector<1x128xf32> to vector<64x128xf32>
    %80 = arith.addf %77, %79 : vector<64x128xf32>
    %81 = arith.addf %6, %80 : vector<64x128xf32>
    %82 = arith.truncf %81 : vector<64x128xf32> to vector<64x128xbf16>
    %c0_43 = arith.constant 0 : index
    %c0_44 = arith.constant 0 : index
    %83 = vector.load %arg16[%c0_43, %c0_44] : memref<128x128xbf16, #tpu.memory_space<vmem>>, vector<128x128xbf16>
    %cst_45 = arith.constant dense<0.000000e+00> : vector<64x128xf32>
    %84 = tpu.matmul %82, %83, %cst_45 {dimension_numbers = #tpu.dot_dimension_numbers<[1], [0], [0], [1], [0, 0, 1, 1], [], []>} : vector<64x128xbf16>, vector<128x128xbf16>, vector<64x128xf32> -> vector<64x128xf32>
    %c0_46 = arith.constant 0 : index
    %c0_47 = arith.constant 0 : index
    %85 = vector.load %arg17[%c0_46, %c0_47] : memref<1x128xf32, #tpu.memory_space<vmem>>, vector<1x128xf32>
    %86 = vector.broadcast %85 : vector<1x128xf32> to vector<64x128xf32>
    %87 = arith.addf %84, %86 : vector<64x128xf32>
    %88 = vector.shape_cast %87 : vector<64x128xf32> to vector<4x16x128xf32>
    %c0_48 = arith.constant 0 : index
    %c0_49 = arith.constant 0 : index
    %c0_50 = arith.constant 0 : index
    %89 = vector.load %arg18[%c0_48, %c0_49, %c0_50] : memref<4x16x128xf32, #tpu.memory_space<vmem>>, vector<4x16x128xf32>
    tpu.vector_store %arg18[%c0_48, %c0_49, %c0_50], %88 {strides = array<i32>} : memref<4x16x128xf32, #tpu.memory_space<vmem>>, vector<4x16x128xf32>,
    return
  }
  func.func @transform_0(%arg0: i32) -> (i32, i32, i32) {
    %c0_i32 = arith.constant 0 : i32
    %c0_i32_0 = arith.constant 0 : i32
    %c0_i32_1 = arith.constant 0 : i32
    return %arg0, %c0_i32, %c0_i32_0 : i32, i32, i32
  }
  func.func @transform_1(%arg0: i32) -> (i32, i32, i32) {
    %c0_i32 = arith.constant 0 : i32
    %c0_i32_0 = arith.constant 0 : i32
    %c0_i32_1 = arith.constant 0 : i32
    return %arg0, %c0_i32, %c0_i32_0 : i32, i32, i32
  }
  func.func @transform_2(%arg0: i32) -> (i32, i32, i32) {
    %c0_i32 = arith.constant 0 : i32
    %c0_i32_0 = arith.constant 0 : i32
    %c0_i32_1 = arith.constant 0 : i32
    return %arg0, %c0_i32, %c0_i32_0 : i32, i32, i32
  }
  func.func @transform_3(%arg0: i32) -> (i32, i32, i32) {
    %c0_i32 = arith.constant 0 : i32
    %c0_i32_0 = arith.constant 0 : i32
    %c0_i32_1 = arith.constant 0 : i32
    return %arg0, %c0_i32, %c0_i32_0 : i32, i32, i32
  }
  func.func @transform_4(%arg0: i32) -> (i32, i32, i32) {
    %c0_i32 = arith.constant 0 : i32
    %c0_i32_0 = arith.constant 0 : i32
    %c0_i32_1 = arith.constant 0 : i32
    return %arg0, %c0_i32, %c0_i32_0 : i32, i32, i32
  }
  func.func @transform_5(%arg0: i32) -> (i32, i32) {
    %c0_i32 = arith.constant 0 : i32
    %c0_i32_0 = arith.constant 0 : i32
    %c0_i32_1 = arith.constant 0 : i32
    return %c0_i32, %c0_i32_0 : i32, i32
  }
  func.func @transform_6(%arg0: i32) -> (i32, i32) {
    %c0_i32 = arith.constant 0 : i32
    %c0_i32_0 = arith.constant 0 : i32
    %c0_i32_1 = arith.constant 0 : i32
    return %c0_i32, %c0_i32_0 : i32, i32
  }
  func.func @transform_7(%arg0: i32) -> (i32, i32) {
    %c0_i32 = arith.constant 0 : i32
    %c0_i32_0 = arith.constant 0 : i32
    %c0_i32_1 = arith.constant 0 : i32
    return %c0_i32, %c0_i32_0 : i32, i32
  }
  func.func @transform_8(%arg0: i32) -> (i32, i32) {
    %c0_i32 = arith.constant 0 : i32
    %c0_i32_0 = arith.constant 0 : i32
    %c0_i32_1 = arith.constant 0 : i32
    return %c0_i32, %c0_i32_0 : i32, i32
  }
  func.func @transform_9(%arg0: i32) -> (i32, i32) {
    %c0_i32 = arith.constant 0 : i32
    %c0_i32_0 = arith.constant 0 : i32
    %c0_i32_1 = arith.constant 0 : i32
    return %c0_i32, %c0_i32_0 : i32, i32
  }
  func.func @transform_10(%arg0: i32) -> (i32, i32) {
    %c0_i32 = arith.constant 0 : i32
    %c0_i32_0 = arith.constant 0 : i32
    %c0_i32_1 = arith.constant 0 : i32
    return %c0_i32, %c0_i32_0 : i32, i32
  }
  func.func @transform_11(%arg0: i32) -> (i32, i32) {
    %c0_i32 = arith.constant 0 : i32
    %c0_i32_0 = arith.constant 0 : i32
    %c0_i32_1 = arith.constant 0 : i32
    return %c0_i32, %c0_i32_0 : i32, i32
  }
  func.func @transform_12(%arg0: i32) -> (i32, i32) {
    %c0_i32 = arith.constant 0 : i32
    %c0_i32_0 = arith.constant 0 : i32
    %c0_i32_1 = arith.constant 0 : i32
    return %c0_i32, %c0_i32_0 : i32, i32
  }
  func.func @transform_13(%arg0: i32) -> (i32, i32) {
    %c0_i32 = arith.constant 0 : i32
    %c0_i32_0 = arith.constant 0 : i32
    %c0_i32_1 = arith.constant 0 : i32
    return %c0_i32, %c0_i32_0 : i32, i32
  }
  func.func @transform_14(%arg0: i32) -> (i32, i32) {
    %c0_i32 = arith.constant 0 : i32
    %c0_i32_0 = arith.constant 0 : i32
    %c0_i32_1 = arith.constant 0 : i32
    return %c0_i32, %c0_i32_0 : i32, i32
  }
  func.func @transform_15(%arg0: i32) -> (i32, i32) {
    %c0_i32 = arith.constant 0 : i32
    %c0_i32_0 = arith.constant 0 : i32
    %c0_i32_1 = arith.constant 0 : i32
    return %c0_i32, %c0_i32_0 : i32, i32
  }
  func.func @transform_16(%arg0: i32) -> (i32, i32) {
    %c0_i32 = arith.constant 0 : i32
    %c0_i32_0 = arith.constant 0 : i32
    %c0_i32_1 = arith.constant 0 : i32
    return %c0_i32, %c0_i32_0 : i32, i32
  }
  func.func @transform_17(%arg0: i32) -> (i32, i32, i32) {
    %c0_i32 = arith.constant 0 : i32
    %c0_i32_0 = arith.constant 0 : i32
    %c0_i32_1 = arith.constant 0 : i32
    return %arg0, %c0_i32, %c0_i32_0 : i32, i32, i32
  }
}

</mosaic_0001>

<bundles_post_ra>
// kernel: gcnn_split.1
= control target key start
LH: loop header
LB: loop body
LE: loop exit
PB: predicated region body
PF: predicated region fallthrough
CT: control target
= control target key end

     0   :  { %s3579_s0 = inlined_call_operand.vmem [shape: bf16[16,16,128], index: 0, kind: input, shape index: {}]   ;;  %s3580_s1 = inlined_call_operand.vmem [shape: bf16[16,16,128], index: 1, kind: input, shape index: {}]   ;;  %s3581_s2 = inlined_call_operand.vmem [shape: bf16[16,16,16], index: 2, kind: input, shape index: {}]   ;;  %s3582_s3 = inlined_call_operand.vmem [shape: f32[16,16,1], index: 3, kind: input, shape index: {}]   ;;  %s3583_s4 = inlined_call_operand.vmem [shape: f32[16,16,1], index: 4, kind: input, shape index: {}]   ;;  %s3584_s5 = inlined_call_operand.vmem [shape: bf16[128,128], index: 5, kind: input, shape index: {}]   ;;  %s3585_s6 = inlined_call_operand.vmem [shape: f32[1,128], index: 6, kind: input, shape index: {}]   ;;  %s3586_s7 = inlined_call_operand.vmem [shape: f32[1,128], index: 7, kind: input, shape index: {}]   ;;  %s3587_s8 = inlined_call_operand.vmem [shape: f32[1,128], index: 8, kind: input, shape index: {}]   ;;  %s3588_s9 = inlined_call_operand.vmem [shape: bf16[128,256], index: 9, kind: input, shape index: {}]   ;;  %s3589_s10 = inlined_call_operand.vmem [shape: f32[1,256], index: 10, kind: input, shape index: {}]   ;;  %s3590_s11 = inlined_call_operand.vmem [shape: bf16[128,128], index: 11, kind: input, shape index: {}]   ;;  %s3591_s12 = inlined_call_operand.vmem [shape: f32[1,128], index: 12, kind: input, shape index: {}]   ;;  %s3592_s13 = inlined_call_operand.vmem [shape: bf16[128,128], index: 13, kind: input, shape index: {}]   ;;  %s3593_s14 = inlined_call_operand.vmem [shape: f32[1,128], index: 14, kind: input, shape index: {}]   ;;  %s3594_s15 = inlined_call_operand.vmem [shape: bf16[128,128], index: 15, kind: input, shape index: {}]   ;;  %s3595_s16 = inlined_call_operand.vmem [shape: f32[1,128], index: 16, kind: input, shape index: {}]   ;;  %s3596_s17 = inlined_call_operand.hbm [shape: f32[16,16,128], index: 17, kind: output, shape index: {}]  }
   0x1   :  { %3606 = sst [smem:[#allocation12_spill]] %s3579_s0 }
   0x2   :  { %3607 = sst [smem:[#allocation13_spill]] %s3580_s1 }
   0x3   :  { %3608 = sst [smem:[#allocation14_spill]] %s3596_s17 }
   0x4   :  { %22 = vsyncpa [#allocation3], 0 }
   0x5   :  { %24 = vsyncpa [#allocation3 + $0x1], 0  ;;  %s2901_s24 = smov 0   ;;  %s2903_s25 = smov 0  }
   0x6   :  { %s2905_s26 = smov 0   ;;  %s2907_s27 = smov 0  }
   0x7 LB: > { %3609 = sst [smem:[#allocation5_spill]] %s2791_s24  ;;  %s2922_s28 = sadd.s32 4294967295, %s2803_s27   ;;  %s2803_s27 = sphi %s2907_s27, %s3625_s27   ;;  %s2799_s26 = sphi %s2905_s26, %s3627_s26   ;;  %s2795_s25 = sphi %s2903_s25, %s3629_s25   ;;  %s2791_s24 = sphi %s2901_s24, %s3628_s24  }
   0x8   : > { %3610 = sst [smem:[#allocation6_spill]] %s2799_s26  ;;  %s2241_s29 = sadd.s32 4294967294, %s2803_s27  }
   0x9   : > { %3611 = sst [smem:[#allocation7_spill]] %s2803_s27  ;;  %s2926_s0 = sadd.s32 1, %s2803_s27  }
   0xa   : > { %3612 = sst [smem:[#allocation8_spill]] %s2926_s0  ;;  %s419_s30 = sadd.s32 1, %s2799_s26 }
   0xb   : > { %s416_s18 = ssub.s32 %s2803_s27, %s2926_s0  ;;  %p429_p0 = scmp.ne.s32.totalorder %s2799_s26, %s2795_s25 }
   0xc   : > { %p417_p1 = scmp.eq.s32.totalorder %s416_s18, 0  ;;  %p430_p2 = scmp.eq.s32.totalorder %s2922_s28, 3 }
   0xd   : > { %p435_p3 = scmp.ne.s32.totalorder %s2795_s25, %s2791_s24  ;;  %p436_p4 = scmp.eq.s32.totalorder %s2241_s29, 3 }
   0xe   : > { %s2937_s19 = scalar_select %p417_p1, %s2799_s26, %s419_s30  }
   0xf   : > { %p2939_p5 = por %p430_p2, %p429_p0  ;;  %p2943_p6 = por %p436_p4, %p435_p3 }
  0x10   : > { %3613 = sst [smem:[#allocation9_spill]] %s2937_s19  ;;  %p2244_p7 = scmp.ge.s32.totalorder %s2803_s27, 1 }
  0x11   : > { %s3614_s1 = scalar_select %p2939_p5, 1, 0 }
  0x12   : > { %s3616_s20 = scalar_select %p2943_p6, 1, 0 }
  0x13   : > { %3615 = sst [smem:[#allocation10_spill]] %s3614_s1  ;;  %p540_p8 = scmp.lt.s32.totalorder %s2803_s27, 5 }
  0x14   : > { %3617 = sst [smem:[#allocation11_spill]] %s3616_s20 }
  0x15   : > { %p541_p9 = pnand %p2244_p7, %p540_p8 }
  0x16   : > { %v2581_v0 = vld [vmem:[%s3584_s5] sm:$0xff] (!%p541_p9)   ;;  %s2246_s23 = sshll.u32 (!%p541_p9), %s2922_s28, 2  ;;  %v2582_v1 = vld [vmem:[%s3584_s5 + $0x8] sm:$0xff] (!%p541_p9)   ;;  %v2805_v2 = vmov (!%p541_p9), 0   ;;  %v2583_v3 = vld [vmem:[%s3584_s5 + $0x10] sm:$0xff] (!%p541_p9)   ;;  %s3618_s19 = sld [smem:[#allocation12_spill]] (!%p541_p9) }
  0x17   : > { %544 = sbr.rel (%p541_p9) target bundleno = 1339 (0x53b), region = 88  ;;  %p618_p10 = scmp.lt.s32.totalorder (!%p541_p9), %s2246_s23, 15  ;;  %2415 = vmatprep.subr.bf16.mxu0 (!%p541_p9), %v2581_v0  ;;  %2579 = vset.pattern.permute.xlu0 (!%p541_p9), %v2805_v2  ;;  %v2584_v4 = vld [vmem:[%s3584_s5 + $0x18] sm:$0xff] (!%p541_p9)   ;;  %v2585_v6 = vld [vmem:[%s3584_s5 + $0x20] sm:$0xff] (!%p541_p9)   ;;  %v2586_v9 = vld [vmem:[%s3584_s5 + $0x28] sm:$0xff] (!%p541_p9)   ;;  %v2806_v22 = vmov (!%p541_p9), 0.0  }
  0x18   : > { %2416 = vmatpush3.bf16.msra.mxu0 (!%p541_p9), %v2581_v0  ;;  %2580 = vset.pattern.permute.xlu1 (!%p541_p9), %v2805_v2  ;;  %v2587_v14 = vld [vmem:[%s3584_s5 + $0x30] sm:$0xff] (!%p541_p9)   ;;  %v2588_v17 = vld [vmem:[%s3584_s5 + $0x38] sm:$0xff] (!%p541_p9)   ;;  %vm2807_vm0 = vmmov (!%p541_p9), 0   ;;  %vm911_vm1 = vcmask (!%p541_p9), 130048   ;;  %v2261_v58 = vld [vmem:[%s3585_s6] ss:$0 sm:$0xff] (!%p541_p9) }
  0x19   : > { %2417 = vmatprep.subr.bf16.mxu0 (!%p541_p9), %v2582_v1  ;;  %2439 = vmatprep.subr.bf16.mxu1 (!%p541_p9), %v2806_v22  ;;  %s2339_s17 = sshll.u32 (!%p541_p9), %s2922_s28, 10 }
  0x1a   : > { %2441 = vmatprep.mubr.msk.bf16.mxu1 (!%p541_p9), %vm2807_vm0, %v2806_v22 }
  0x1c   : > { %2418 = vmatpush3.bf16.msra.mxu0 (!%p541_p9), %v2582_v1 }
  0x1d   : > { %2419 = vmatprep.subr.bf16.mxu0 (!%p541_p9), %v2583_v3 }
  0x1e   : > { %s3631_s23 = smov (!%p618_p10, %s2246_s23), 15 }
  0x1f   : > { %s2964_s22 = sshll.u32 %s3631_s23, 3  ;;  %s2336_s24 = sshll.u32 %s3631_s23, 4 }
  0x20   : > { %s2970_s26 = scalar_lea.vmem %s3618_s19, %s2964_s22  ;;  %s650_s27 = scalar_lea.vmem %s3583_s4, %s2336_s24  ;;  %2420 = vmatpush3.bf16.msra.mxu0 %v2583_v3 }
  0x21   : > { %v2589_v5 = vld [vmem:[%s2970_s26] sm:$0xff]   ;;  %2421 = vmatprep.subr.bf16.mxu0 %v2584_v4  ;;  %v840_v8 = vld [vmem:[%s650_s27 + $0x10] sm:$0xff]  ;;  %s2989_s20 = scalar_lea.vmem %s3581_s2, %s2964_s22  ;;  %v839_v10 = vld [vmem:[%s650_s27 + $0x8] sm:$0xff]  ;;  %s3619_s19 = sld [smem:[#allocation13_spill]] }
  0x22   : > { %2431 = vmatprep.mubr.bf16.mxu0 %v2589_v5  ;;  %v838_v7 = vld [vmem:[%s650_s27] sm:$0xff]  ;;  %858 = vperm.xlu1 %2580, %v840_v8   ;;  %v841_v11 = vld [vmem:[%s650_s27 + $0x18] sm:$0xff]  ;;  %v843_v12 = vld [vmem:[%s650_s27 + $0x28] sm:$0xff]  ;;  %s3116_s18 = scalar_lea.vmem %s3582_s3, %s2336_s24 }
  0x23   : > { %848 = vperm.xlu0 %2579, %v838_v7   ;;  %v842_v13 = vld [vmem:[%s650_s27 + $0x20] sm:$0xff]  ;;  %v845_v15 = vld [vmem:[%s650_s27 + $0x38] sm:$0xff]  ;;  %v844_v16 = vld [vmem:[%s650_s27 + $0x30] sm:$0xff] }
  0x24   : > { %2422 = vmatpush3.bf16.msra.mxu0 %v2584_v4  ;;  %v2590_v18 = vld [vmem:[%s2970_s26 + $0x8] sm:$0xff]   ;;  %v2591_v19 = vld [vmem:[%s2970_s26 + $0x10] sm:$0xff]   ;;  %v2592_v20 = vld [vmem:[%s2970_s26 + $0x18] sm:$0xff]   ;;  %s614_s26 = sand.u32 1, %s2795_s25  }
  0x25   : > { %2423 = vmatprep.subr.bf16.mxu0 %v2585_v6  ;;  %v2593_v38 = vld [vmem:[%s2989_s20] sm:$0xff]   ;;  %v2594_v47 = vld [vmem:[%s2989_s20 + $0x8] sm:$0xff]   ;;  %v2595_v55 = vld [vmem:[%s2989_s20 + $0x10] sm:$0xff]   ;;  %s3538_s28 = scalar_lea.sflag [#allocation3], %s614_s26 }
  0x26   : > { %863 = vperm.xlu1 %2580, %v841_v11   ;;  %v2596_v57 = vld [vmem:[%s2989_s20 + $0x18] sm:$0xff]  }
  0x27   : > { %853 = vperm.xlu0 %2579, %v839_v10   ;;  %s3007_s30 = scalar_lea.vmem %s3619_s19, %s2964_s22  ;;  %s2245_s22 = sshll.u32 %s614_s26, 6 }
  0x28   : > { %2424 = vmatpush3.bf16.msra.mxu0 %v2585_v6  ;;  %v2341_v21 = vld [vmem:[%s3007_s30] sm:$0xff]   ;;  %v2356_v23 = vld [vmem:[%s3007_s30 + $0x8] sm:$0xff]   ;;  %v2357_v36 = vld [vmem:[%s3007_s30 + $0x10] sm:$0xff]   ;;  %s616_s21 = scalar_lea.vmem [#allocation2], %s2245_s22 }
  0x29   : > { %2425 = vmatprep.subr.bf16.mxu0 %v2586_v9  ;;  %v2342_v24 = vunpack.c.l.bf16 %v2341_v21  ;;  %v2343_v27 = vunpack.c.h.bf16 %v2341_v21  ;;  %v2346_v28 = vunpack.c.l.bf16 %v2356_v23  ;;  %v2347_v29 = vunpack.c.h.bf16 %v2356_v23  ;;  %v2358_v46 = vld [vmem:[%s3007_s30 + $0x18] sm:$0xff]   ;;  %s2131_s1 = sshll.u32 %s616_s21, 4  ;;  %s2808_s30 = smov [#allocation2]   ;;  %s3534_s1 = int_to_ptr.vmem [resolvable:$true] %s2131_s1 }
  0x2a   : > { %873 = vperm.xlu1 %2580, %v843_v12   ;;  %v2351_v40 = vunpack.c.h.bf16 %v2357_v36  ;;  %v2350_v41 = vunpack.c.l.bf16 %v2357_v36  ;;  %v2355_v49 = vunpack.c.h.bf16 %v2358_v46  ;;  %v2354_v50 = vunpack.c.l.bf16 %v2358_v46  ;;  %v2597_v12 = vld [vmem:[%s3590_s11] sm:$0xff]   ;;  %v2599_v46 = vld [vmem:[%s3590_s11 + $0x10] sm:$0xff]   ;;  %s2741_s19 = scalar_lea.vmem %s3534_s1, 1024  ;;  %s2745_s22 = sshll.u32 %s2808_s30, 4  ;;  %s2746_s22 = int_to_ptr.vmem [resolvable:$false] %s2745_s22 }
  0x2b   : > { %868 = vperm.xlu0 %2579, %v842_v13   ;;  %p2742_p11 = scmp.ne.s32.totalorder %s3534_s1, %s2741_s19  ;;  %s2747_s0 = scalar_lea.vmem %s2746_s22, 2048 }
  0x2c   : > { %2426 = vmatpush3.bf16.msra.mxu0 %v2586_v9  ;;  %p2748_p0 = scmp.lt.s32.totalorder %s3534_s1, %s2746_s22  ;;  %p2749_p1 = scmp.lt.s32.totalorder %s2747_s0, %s2741_s19 }
  0x2d   : > { %2427 = vmatprep.subr.bf16.mxu0 %v2587_v14  ;;  %p2743_p12 = pnand %p2742_p11, %p2939_p5 }
  0x2e   : > { %883 = vperm.xlu1 %2580, %v845_v15   ;;  %p2750_p2 = por %p2749_p1, %p2748_p0 }
  0x2f   : > { %878 = vperm.xlu0 %2579, %v844_v16   ;;  %p2744_p13 = pneg %p2743_p12 }
  0x30   : > { %2428 = vmatpush3.bf16.msra.mxu0 %v2587_v14 }
  0x31   : > { %2429 = vmatprep.subr.bf16.mxu0 %v2588_v17  ;;  %p2751_p3 = pnand %p2750_p2, %p2744_p13 }
  0x34   : > { %2430 = vmatpush3.bf16.msra.mxu0 %v2588_v17 }
  0x35   : > { %2463 = vmatprep.subr.bf16.mxu0 %v2597_v12 }
  0x37   : > { %2432 = vmatmul.mubr.bf16.vlgmr.msra.gmra.mrb[0].mxu0 %v2590_v18 }
  0x38   : > { %2435 = vmatprep.mubr.bf16.mxu0 %v2591_v19  ;;  %2464 = vmatpush3.bf16.msra.mxu0 %v2597_v12  ;;  %v2615_v12 = vld [vmem:[%s3590_s11 + $0x30] sm:$0xff]  }
  0x3f   : > { %2436 = vmatmul.mubr.bf16.gmra.mrb[4].mxu0 %v2592_v20 }
  0xa1   : > { %v859_v26 = vpop.permute.xlu1 %858 }
  0xa2   : > { %v849_v25 = vpop.permute.xlu0 %848  ;;  %v888_v34 = vmul.f32 %v2346_v28, %v859_v26 }
  0xa3   : > { %v886_v30 = vmul.f32 %v2342_v24, %v849_v25 }
  0xa5   : > { %v864_v32 = vpop.permute.xlu1 %863 }
  0xa6   : > { %v854_v31 = vpop.permute.xlu0 %853  ;;  %v889_v35 = vmul.f32 %v2347_v29, %v864_v32 }
  0xa7   : > { %v887_v33 = vmul.f32 %v2343_v27, %v854_v31 }
  0xa8   : > { %v895_v39 = vpack.c.bf16 %v889_v35, %v888_v34 }
  0xa9   : > { %v894_v37 = vpack.c.bf16 %v887_v33, %v886_v30  ;;  %v874_v42 = vpop.permute.xlu1 %873 }
  0xaa   : > { %v869_v43 = vpop.permute.xlu0 %868  ;;  %v891_v44 = vmul.f32 %v2351_v40, %v874_v42 }
  0xab   : > { %2440 = vmatpush3.bf16.msra.mxu1 %v894_v37  ;;  %v890_v45 = vmul.f32 %v2350_v41, %v869_v43 }
  0xac   : > { %2445 = vmatprep.subr.bf16.mxu1 %v2806_v22 }
  0xad   : > { %v896_v48 = vpack.c.bf16 %v891_v44, %v890_v45  ;;  %v884_v51 = vpop.permute.xlu1 %883  ;;  %v2598_v45 = vld [vmem:[%s3590_s11 + $0x8] sm:$0xff]  }
  0xae   : > { %2442 = vmatmul.mubr.msk.bf16.vlgmr.msra.gmra.mrb[0].mxu1 %vm911_vm1, %v2593_v38  ;;  %v879_v52 = vpop.permute.xlu0 %878  ;;  %v893_v53 = vmul.f32 %v2355_v49, %v884_v51  ;;  %2465 = vmatprep.subr.bf16.mxu0 %v2598_v45  ;;  %v2603_v49 = vld [vmem:[%s3590_s11 + $0x18] sm:$0xff]  }
  0xaf   : > { %2446 = vmatpush3.bf16.msra.mxu1 %v895_v39  ;;  %2447 = vmatprep.mubr.msk.bf16.mxu1 %vm2807_vm0, %v2806_v22  ;;  %v892_v54 = vmul.f32 %v2354_v50, %v879_v52  ;;  %v2606_v50 = vld [vmem:[%s3588_s9 + $0x14] ss:$8 sps:$4 sm:$0xff]   ;;  %v2604_v51 = vld [vmem:[%s3588_s9 + $0x10] ss:$8 sps:$4 sm:$0xff]   ;;  %v1103_v52 = vld [vmem:[%s3116_s18] sm:$0xff] }
  0xb0   : > { %2451 = vmatprep.subr.bf16.mxu1 %v2806_v22  ;;  %2466 = vmatpush3.bf16.msra.mxu0 %v2598_v45 }
  0xb1   : > { %v897_v56 = vpack.c.bf16 %v893_v53, %v892_v54  ;;  %2467 = vmatprep.subr.bf16.mxu0 %v2599_v46  ;;  %v2607_v53 = vld [vmem:[%s3590_s11 + $0x20] sm:$0xff]  }
  0xb2   : > { %v2610_v54 = vld [vmem:[%s3588_s9 + $0x24] ss:$8 sps:$4 sm:$0xff]  }
  0xb4   : > { %2468 = vmatpush3.bf16.msra.mxu0 %v2599_v46 }
  0xb5   : > { %2469 = vmatprep.subr.bf16.mxu0 %v2603_v49 }
  0xb6   : > { %2448 = vmatmul.mubr.msk.bf16.vlgmr.msra.gmra.mrb[4].mxu1 %vm911_vm1, %v2594_v47  ;;  %v2602_v47 = vld [vmem:[%s3588_s9 + $0x4] ss:$8 sps:$4 sm:$0xff]  }
  0xb7   : > { %2452 = vmatpush3.bf16.msra.mxu1 %v896_v48  ;;  %2453 = vmatprep.mubr.msk.bf16.mxu1 %vm2807_vm0, %v2806_v22  ;;  %v2600_v48 = vld [vmem:[%s3588_s9] ss:$8 sps:$4 sm:$0xff]  }
  0xb8   : > { %2457 = vmatprep.subr.bf16.mxu1 %v2806_v22  ;;  %2470 = vmatpush3.bf16.msra.mxu0 %v2603_v49 }
  0xb9   : > { %2471 = vmatprep.subr.bf16.mxu0 %v2607_v53 }
  0xbc   : > { %2472 = vmatpush3.bf16.msra.mxu0 %v2607_v53 }
  0xbe   : > { %2454 = vmatmul.mubr.msk.bf16.vlgmr.msra.gmra.mrb[8].mxu1 %vm911_vm1, %v2595_v55  ;;  %v1105_v55 = vld [vmem:[%s3116_s18 + $0x10] sm:$0xff] }
  0xbf   : > { %2458 = vmatpush3.bf16.msra.mxu1 %v897_v56  ;;  %2459 = vmatprep.mubr.msk.bf16.mxu1 %vm2807_vm0, %v2806_v22  ;;  %v2608_v56 = vld [vmem:[%s3588_s9 + $0x20] ss:$8 sps:$4 sm:$0xff]  }
  0xc0   : > { %1447 = vmatprep.subr.bf16.mxu1 %v2602_v47 }
  0xc6   : > { %2460 = vmatmul.mubr.msk.bf16.vlgmr.msra.gmra.mrb[12].mxu1 %vm911_vm1, %v2596_v57 }
  0xc7   : > { %1479 = vmatprep.mubr.bf16.mxu1 %v2805_v2  ;;  %1448 = vmatpush1.bf16.msra.mxu1 %v2600_v48 }
  0xc8   : > { %1449 = vmatprep.subr.bf16.mxu1 %v2606_v50 }
  0xcb   : > { %1450 = vmatpush1.bf16.msra.mxu1 %v2604_v51 }
  0xcc   : > { %1451 = vmatprep.subr.bf16.mxu1 %v2610_v54 }
  0xcf   : > { %1452 = vmatpush1.bf16.msra.mxu1 %v2608_v56 }
 0x10a   : > { %v2433_v59 = vpop.f32.mrb[0].mxu0 }
 0x10b   : > { %v791_v60 = vpop.f32.mrb[1].mxu0  ;;  %v3034_v1 = vadd.f32 %v2433_v59, %v2261_v58 }
 0x10c   : > { %v3029_v61 = vadd.f32 %v2261_v58, %v791_v60  ;;  %v2434_v62 = vpop.f32.mrb[2].mxu0  ;;  %v2614_v60 = vld [vmem:[%s3588_s9 + $0x34] ss:$8 sps:$4 sm:$0xff]  }
 0x10d   : > { %v794_v63 = vpop.f32.mrb[3].mxu0  ;;  %v3038_v5 = vadd.f32 %v2434_v62, %v2261_v58  ;;  %v1106_v62 = vld [vmem:[%s3116_s18 + $0x18] sm:$0xff]  ;;  %1453 = vmatprep.subr.bf16.mxu1 %v2614_v60 }
 0x10e   : > { %v3031_v0 = vadd.f32 %v2261_v58, %v794_v63  ;;  %1159 = vadd.xlane.f32.xlu0 %v3029_v61 }
 0x110   : > { %1161 = vadd.xlane.f32.xlu1 %v3031_v0 }
 0x112   : > { %v2437_v3 = vpop.f32.mrb[4].mxu0  ;;  %1163 = vadd.xlane.f32.xlu0 %v3034_v1 }
 0x113   : > { %v807_v4 = vpop.f32.mrb[5].mxu0  ;;  %v3042_v9 = vadd.f32 %v2437_v3, %v2261_v58  ;;  %v2612_v3 = vld [vmem:[%s3588_s9 + $0x30] ss:$8 sps:$4 sm:$0xff]  }
 0x114   : > { %v3040_v6 = vadd.f32 %v2261_v58, %v807_v4  ;;  %v2438_v7 = vpop.f32.mrb[6].mxu0  ;;  %v1104_v4 = vld [vmem:[%s3116_s18 + $0x8] sm:$0xff]  ;;  %1454 = vmatpush1.bf16.msra.mxu1 %v2612_v3 }
 0x115   : > { %v810_v8 = vpop.f32.mrb[7].mxu0  ;;  %v3048_v11 = vadd.f32 %v2438_v7, %v2261_v58 }
 0x116   : > { %1167 = vadd.xlane.f32.xlu1 %v3040_v6  ;;  %1165 = vadd.xlane.f32.xlu0 %v3038_v5  ;;  %v3046_v10 = vadd.f32 %v2261_v58, %v810_v8  ;;  %v2611_v58 = vld [vmem:[%s3590_s11 + $0x28] sm:$0xff]  }
 0x117   : > { %2473 = vmatprep.subr.bf16.mxu0 %v2611_v58 }
 0x118   : > { %2474 = vmatpush3.bf16.msra.mxu0 %v2611_v58 }
 0x119   : > { %2475 = vmatprep.subr.bf16.mxu0 %v2615_v12 }
 0x11a   : > { %1171 = vadd.xlane.f32.xlu1 %v3042_v9  ;;  %1169 = vadd.xlane.f32.xlu0 %v3046_v10 }
 0x11c   : > { %2476 = vmatpush3.bf16.msra.mxu0 %v2615_v12 }
 0x11e   : > { %1173 = vadd.xlane.f32.xlu0 %v3048_v11 }
 0x181   : > { %v3135_v57 = vpop.f32.mrb[0].mxu1 }
 0x182   : > { %v2443_v59 = vpop.f32.mrb[1].mxu1 }
 0x183   : > { %v3144_v63 = vpop.f32.mrb[2].mxu1  ;;  %v3205_v59 = vld [vmem:[%s3586_s7] ss:$0 sm:$0xff] }
 0x184   : > { %v2444_v7 = vpop.f32.mrb[3].mxu1 }
 0x189   : > { %v3150_v8 = vpop.f32.mrb[4].mxu1 }
 0x19b   : > { %v1160_v13 = vpop.xlane.xlu0 %1159 }
 0x19c   : > { %v1176_v14 = vmul.f32 0.0078125, %v1160_v13  ;;  %v2449_v13 = vpop.f32.mrb[5].mxu1 }
 0x19d   : > { %v1162_v15 = vpop.xlane.xlu1 %1161 }
 0x19e   : > { %v3057_v16 = vsub.f32 %v3029_v61, %v1176_v14  ;;  %v1177_v17 = vmul.f32 0.0078125, %v1162_v15  ;;  %v2618_v14 = vld [vmem:[%s3588_s9 + $0x44] ss:$8 sps:$4 sm:$0xff]  }
 0x19f   : > { %v1164_v18 = vpop.xlane.xlu0 %1163  ;;  %v1108_v15 = vld [vmem:[%s3116_s18 + $0x28] sm:$0xff]  ;;  %1455 = vmatprep.subr.bf16.mxu1 %v2618_v14 }
 0x1a0   : > { %v3060_v19 = vsub.f32 %v3031_v0, %v1177_v17  ;;  %v1178_v20 = vmul.f32 0.0078125, %v1164_v18  ;;  %v1192_v21 = vmul.f32 %v3057_v16, %v3057_v16  ;;  %v2616_v17 = vld [vmem:[%s3588_s9 + $0x40] ss:$8 sps:$4 sm:$0xff]   ;;  %v3214_v14 = vmul.f32 %v3205_v59, %v3057_v16 }
 0x1a1   : > { %v1107_v18 = vld [vmem:[%s3116_s18 + $0x20] sm:$0xff]  ;;  %1456 = vmatpush1.bf16.msra.mxu1 %v2616_v17 }
 0x1a2   : > { %v3065_v22 = vsub.f32 %v3034_v1, %v1178_v20  ;;  %1200 = vadd.xlane.f32.xlu1 %v1192_v21  ;;  %v1193_v23 = vmul.f32 %v3060_v19, %v3060_v19  ;;  %v3163_v20 = vpop.f32.mrb[6].mxu1  ;;  %v2619_v21 = vld [vmem:[%s3590_s11 + $0x38] sm:$0xff]  }
 0x1a3   : > { %v1168_v24 = vpop.xlane.xlu1 %1167  ;;  %v1166_v25 = vpop.xlane.xlu0 %1165  ;;  %2477 = vmatprep.subr.bf16.mxu0 %v2619_v21 }
 0x1a4   : > { %v1180_v26 = vmul.f32 0.0078125, %v1168_v24  ;;  %v1179_v27 = vmul.f32 0.0078125, %v1166_v25  ;;  %1202 = vadd.xlane.f32.xlu0 %v1193_v23  ;;  %v1194_v28 = vmul.f32 %v3065_v22, %v3065_v22  ;;  %v2450_v23 = vpop.f32.mrb[7].mxu1  ;;  %v2622_v24 = vld [vmem:[%s3588_s9 + $0x54] ss:$8 sps:$4 sm:$0xff]   ;;  %2478 = vmatpush3.bf16.msra.mxu0 %v2619_v21 }
 0x1a5   : > { %v1110_v25 = vld [vmem:[%s3116_s18 + $0x38] sm:$0xff]  ;;  %1457 = vmatprep.subr.bf16.mxu1 %v2622_v24 }
 0x1a6   : > { %v3072_v29 = vsub.f32 %v3040_v6, %v1180_v26  ;;  %v3075_v30 = vsub.f32 %v3038_v5, %v1179_v27  ;;  %1204 = vadd.xlane.f32.xlu1 %v1194_v28  ;;  %v3172_v26 = vpop.f32.mrb[8].mxu1  ;;  %v2620_v27 = vld [vmem:[%s3588_s9 + $0x50] ss:$8 sps:$4 sm:$0xff]  }
 0x1a7   : > { %v1172_v31 = vpop.xlane.xlu1 %1171  ;;  %v1170_v32 = vpop.xlane.xlu0 %1169  ;;  %v1109_v28 = vld [vmem:[%s3116_s18 + $0x30] sm:$0xff]  ;;  %1458 = vmatpush1.bf16.msra.mxu1 %v2620_v27  ;;  %s3621_s18 = sld [smem:[#allocation14_spill]] }
 0x1a8   : > { %v1182_v33 = vmul.f32 0.0078125, %v1172_v31  ;;  %v1181_v34 = vmul.f32 0.0078125, %v1170_v32  ;;  %v1196_v35 = vmul.f32 %v3072_v29, %v3072_v29  ;;  %v1195_v36 = vmul.f32 %v3075_v30, %v3075_v30  ;;  %v2455_v31 = vpop.f32.mrb[9].mxu1 }
 0x1a9   : > { %v3178_v32 = vpop.f32.mrb[10].mxu1 }
 0x1aa   : > { %v3082_v37 = vsub.f32 %v3042_v9, %v1182_v33  ;;  %v3085_v38 = vsub.f32 %v3046_v10, %v1181_v34  ;;  %1208 = vadd.xlane.f32.xlu1 %v1196_v35  ;;  %1206 = vadd.xlane.f32.xlu0 %v1195_v36  ;;  %v2456_v33 = vpop.f32.mrb[11].mxu1  ;;  %v2625_v34 = vld [vmem:[%s3588_s9 + $0x64] ss:$8 sps:$4 sm:$0xff]   ;;  %v2623_v36 = vld [vmem:[%s3588_s9 + $0x60] ss:$8 sps:$4 sm:$0xff]  }
 0x1ab   : > { %v1174_v39 = vpop.xlane.xlu0 %1173  ;;  %v3183_v35 = vpop.f32.mrb[12].mxu1  ;;  %1459 = vmatprep.subr.bf16.mxu1 %v2625_v34 }
 0x1ac   : > { %v1183_v40 = vmul.f32 0.0078125, %v1174_v39  ;;  %v1198_v41 = vmul.f32 %v3082_v37, %v3082_v37  ;;  %v1197_v42 = vmul.f32 %v3085_v38, %v3085_v38  ;;  %v2461_v39 = vpop.f32.mrb[13].mxu1  ;;  %1460 = vmatpush1.bf16.msra.mxu1 %v2623_v36 }
 0x1ad   : > { %s3532_s24 = scalar_lea.hbm %s3621_s18, %s2339_s17 }
 0x1ae   : > { %v3092_v43 = vsub.f32 %v3048_v11, %v1183_v40  ;;  %1212 = vadd.xlane.f32.xlu1 %v1198_v41  ;;  %1210 = vadd.xlane.f32.xlu0 %v1197_v42  ;;  %v3188_v40 = vpop.f32.mrb[14].mxu1  ;;  %v2626_v41 = vld [vmem:[%s3588_s9 + $0x70] ss:$8 sps:$4 sm:$0xff]   ;;  %v2628_v42 = vld [vmem:[%s3588_s9 + $0x74] ss:$8 sps:$4 sm:$0xff]  }
 0x1af   : > { %1461 = vmatprep.subr.bf16.mxu1 %v2628_v42 }
 0x1b0   : > { %v1199_v44 = vmul.f32 %v3092_v43, %v3092_v43  ;;  %1462 = vmatpush1.bf16.msra.mxu1 %v2626_v41 }
 0x1b2   : > { %1214 = vadd.xlane.f32.xlu0 %v1199_v44  ;;  %v2462_v44 = vpop.f32.mrb[15].mxu1 }
 0x1bf   : > { %1113 = vperm.xlu1 %2580, %v1103_v52  }
 0x1c3   : > { %1123 = vperm.xlu1 %2580, %v1105_v55  }
 0x1c7   : > { %1128 = vperm.xlu1 %2580, %v1106_v62  }
 0x1c8   : > { %1118 = vperm.xlu0 %2579, %v1104_v4  }
 0x1cb   : > { %1138 = vperm.xlu1 %2580, %v1108_v15  }
 0x1cc   : > { %1133 = vperm.xlu0 %2579, %v1107_v18  }
 0x1cf   : > { %1148 = vperm.xlu1 %2580, %v1110_v25  }
 0x1d0   : > { %1143 = vperm.xlu0 %2579, %v1109_v28  }
 0x22f   : > { %v1201_v45 = vpop.xlane.xlu1 %1200 }
 0x230   : > { %v1217_v46 = vmul.f32 0.007874016, %v1201_v45 }
 0x231   : > { %v1203_v47 = vpop.xlane.xlu0 %1202 }
 0x232   : > { %2645 = vrsqrt.f32 %v1217_v46  ;;  %v1218_v48 = vmul.f32 0.007874016, %v1203_v47  ;;  %vm1227_vm2 = vcmp.eq.f32.partialorder %v1217_v46, inf  ;;  %v1230_v4 = vand.u32 2147483648, %v1217_v46 }
 0x233   : > { %v1205_v49 = vpop.xlane.xlu1 %1204  ;;  %vm1229_vm3 = vcmp.eq.f32.partialorder %v1217_v46, 0.0 }
 0x234   : > { %v1219_v50 = vmul.f32 0.007874016, %v1205_v49  ;;  %2647 = vrsqrt.f32 %v1218_v48  ;;  %vm1234_vm4 = vcmp.eq.f32.partialorder %v1218_v48, inf  ;;  %v1237_v24 = vand.u32 2147483648, %v1218_v48 }
 0x235   : > { %vm1236_vm5 = vcmp.eq.f32.partialorder %v1218_v48, 0.0 }
 0x236   : > { %2649 = vrsqrt.f32 %v1219_v50  ;;  %vm1241_vm6 = vcmp.eq.f32.partialorder %v1219_v50, inf  ;;  %v1244_v16 = vand.u32 2147483648, %v1219_v50  ;;  %vm1243_vm7 = vcmp.eq.f32.partialorder %v1219_v50, 0.0 }
 0x237   : > { %v1209_v51 = vpop.xlane.xlu1 %1208  ;;  %v1207_v52 = vpop.xlane.xlu0 %1206 }
 0x238   : > { %v3196_v53 = vmul.f32 0.007874016, %v1209_v51  ;;  %v3198_v54 = vmul.f32 0.007874016, %v1207_v52 }
 0x23a   : > { %2651 = vrsqrt.f32 %v3196_v53  ;;  %vm1255_vm8 = vcmp.eq.f32.partialorder %v3196_v53, inf  ;;  %vm1257_vm9 = vcmp.eq.f32.partialorder %v3196_v53, 0.0  ;;  %v1258_v41 = vand.u32 2147483648, %v3196_v53 }
 0x23b   : > { %2653 = vrsqrt.f32 %v3198_v54  ;;  %v1213_v56 = vpop.xlane.xlu1 %1212  ;;  %v1211_v58 = vpop.xlane.xlu0 %1210  ;;  %vm1248_vm10 = vcmp.eq.f32.partialorder %v3198_v54, inf  ;;  %vm1250_vm11 = vcmp.eq.f32.partialorder %v3198_v54, 0.0 }
 0x23c   : > { %v2646_v55 = vpop.eup %2645  ;;  %v3207_v62 = vmul.f32 0.007874016, %v1213_v56  ;;  %v3209_v3 = vmul.f32 0.007874016, %v1211_v58 }
 0x23d   : > { %v1226_v60 = vmul.f32 %v2646_v55, %v1217_v46 }
 0x23e   : > { %v2648_v7 = vpop.eup %2647  ;;  %2655 = vrsqrt.f32 %v3207_v62  ;;  %vm1269_vm12 = vcmp.eq.f32.partialorder %v3207_v62, inf  ;;  %vm1271_vm13 = vcmp.eq.f32.partialorder %v3207_v62, 0.0  ;;  %vm1262_vm14 = vcmp.eq.f32.partialorder %v3209_v3, inf }
 0x23f   : > { %v1228_v12 = vsel %vm1227_vm2, %v1217_v46, %v1226_v60  ;;  %v1233_v17 = vmul.f32 %v2648_v7, %v1218_v48  ;;  %2657 = vrsqrt.f32 %v3209_v3  ;;  %v1114_v18 = vpop.permute.xlu1 %1113  ;;  %v1215_v21 = vpop.xlane.xlu0 %1214  ;;  %vm1264_vm15 = vcmp.eq.f32.partialorder %v3209_v3, 0.0 }
 0x240   : > { %v2650_v13 = vpop.eup %2649  ;;  %v1231_v15 = vsel %vm1229_vm3, %v1230_v4, %v1228_v12  ;;  %v3217_v28 = vmul.f32 0.007874016, %v1215_v21 }
 0x241   : > { %v1281_v23 = vadd.f32 1e-06, %v1231_v15  ;;  %v1240_v25 = vmul.f32 %v2650_v13, %v1219_v50  ;;  %v1235_v27 = vsel %vm1234_vm4, %v1218_v48, %v1233_v17  ;;  %v1251_v48 = vand.u32 2147483648, %v3198_v54 }
 0x242   : > { %v1238_v31 = vsel %vm1236_vm5, %v1237_v24, %v1235_v27  ;;  %vm1276_vm0 = vcmp.eq.f32.partialorder %v3217_v28, inf  ;;  %vm1278_vm1 = vcmp.eq.f32.partialorder %v3217_v28, 0.0 }
 0x243   : > { %2659 = vrcp.f32 %v1281_v23  ;;  %v1242_v33 = vsel %vm1241_vm6, %v1219_v50, %v1240_v25  ;;  %v1282_v34 = vadd.f32 1e-06, %v1238_v31  ;;  %v1124_v36 = vpop.permute.xlu1 %1123  ;;  %v1151_v50 = vmul.f32 %v1114_v18, %v3135_v57 }
 0x244   : > { %2661 = vrsqrt.f32 %v3217_v28  ;;  %v2652_v39 = vpop.eup %2651  ;;  %v1245_v42 = vsel %vm1243_vm7, %v1244_v16, %v1242_v33  ;;  %v1153_v51 = vmul.f32 %v1124_v36, %v3150_v8  ;;  %v1272_v8 = vand.u32 2147483648, %v3207_v62 }
 0x245   : > { %v2654_v44 = vpop.eup %2653  ;;  %2663 = vrcp.f32 %v1282_v34  ;;  %v1254_v45 = vmul.f32 %v2652_v39, %v3196_v53  ;;  %v1283_v46 = vadd.f32 1e-06, %v1245_v42  ;;  %v1305_v16 = vmul.f32 %v3205_v59, %v3060_v19 }
 0x246   : > { %v1247_v47 = vmul.f32 %v2654_v44, %v3198_v54  ;;  %v1279_v19 = vand.u32 2147483648, %v3217_v28 }
 0x247   : > { %v1256_v49 = vsel %vm1255_vm8, %v3196_v53, %v1254_v45  ;;  %v1129_v52 = vpop.permute.xlu1 %1128  ;;  %v1119_v55 = vpop.permute.xlu0 %1118  ;;  %2665 = vrcp.f32 %v1283_v46 }
 0x248   : > { %v2656_v56 = vpop.eup %2655  ;;  %v1249_v58 = vsel %vm1248_vm10, %v3198_v54, %v1247_v47  ;;  %v1154_v60 = vmul.f32 %v1129_v52, %v3163_v20  ;;  %v1152_v4 = vmul.f32 %v1119_v55, %v3144_v63  ;;  %v1259_v7 = vsel %vm1257_vm9, %v1258_v41, %v1256_v49 }
 0x249   : > { %v2658_v12 = vpop.eup %2657  ;;  %v1268_v57 = vmul.f32 %v2656_v56, %v3207_v62  ;;  %v1252_v13 = vsel %vm1250_vm11, %v1251_v48, %v1249_v58  ;;  %v1285_v15 = vadd.f32 1e-06, %v1259_v7  ;;  %v1265_v20 = vand.u32 2147483648, %v3209_v3 }
 0x24a   : > { %v1261_v17 = vmul.f32 %v2658_v12, %v3209_v3  ;;  %v1521_v18 = vpack.c.bf16 %v1154_v60, %v1153_v51  ;;  %v1520_v21 = vpack.c.bf16 %v1152_v4, %v1151_v50  ;;  %v1284_v23 = vadd.f32 1e-06, %v1252_v13 }
 0x24b   : > { %v1270_v63 = vsel %vm1269_vm12, %v3207_v62, %v1268_v57  ;;  %v1139_v53 = vpop.permute.xlu1 %1138  ;;  %v1134_v24 = vpop.permute.xlu0 %1133  ;;  %v1306_v58 = vmul.f32 %v3205_v59, %v3065_v22  ;;  %v1308_v12 = vmul.f32 %v3205_v59, %v3072_v29  ;;  %v1309_v22 = vmul.f32 %v3205_v59, %v3085_v38 }
 0x24c   : > { %v1263_v25 = vsel %vm1262_vm14, %v3209_v3, %v1261_v17  ;;  %v1156_v27 = vmul.f32 %v1139_v53, %v3178_v32  ;;  %v1155_v31 = vmul.f32 %v1134_v24, %v3172_v26  ;;  %2479 = vmatprep.mubr.bf16.mxu0 %v1520_v21  ;;  %2667 = vrcp.f32 %v1284_v23  ;;  %v2283_v26 = vld [vmem:[%s3587_s8] ss:$0 sm:$0xff] }
 0x24d   : > { %v2660_v54 = vpop.eup %2659  ;;  %2480 = vmatmul.mubr.bf16.vlgmr.msra.gmra.mrb[8].mxu0 %v1521_v18  ;;  %v1266_v34 = vsel %vm1264_vm15, %v1265_v20, %v1263_v25  ;;  %2669 = vrcp.f32 %v1285_v15  ;;  %v1273_v36 = vsel %vm1271_vm13, %v1272_v8, %v1270_v63  ;;  %v1311_v23 = vmul.f32 %v3205_v59, %v3092_v43  ;;  %v2630_v43 = vld [vmem:[%s3592_s13 + $0x8] sm:$0xff]  }
 0x24e   : > { %v2662_v33 = vpop.eup %2661  ;;  %v1522_v41 = vpack.c.bf16 %v1156_v27, %v1155_v31  ;;  %v1312_v3 = vmul.f32 %v2660_v54, %v3214_v14  ;;  %v1286_v32 = vadd.f32 1e-06, %v1266_v34  ;;  %v1287_v45 = vadd.f32 1e-06, %v1273_v36  ;;  %v2633_v31 = vld [vmem:[%s3592_s13 + $0x20] sm:$0xff]   ;;  %v2636_v34 = vld [vmem:[%s3592_s13 + $0x38] sm:$0xff]  }
 0x24f   : > { %v1275_v39 = vmul.f32 %v2662_v33, %v3217_v28  ;;  %v2664_v42 = vpop.eup %2663  ;;  %v1149_v44 = vpop.permute.xlu1 %1148  ;;  %v2634_v33 = vld [vmem:[%s3592_s13 + $0x28] sm:$0xff]   ;;  %v2637_v36 = vld [vmem:[%s3594_s15] sm:$0xff]  }
 0x250   : > { %v1144_v62 = vpop.permute.xlu0 %1143  ;;  %v1158_v47 = vmul.f32 %v1149_v44, %v3188_v40  ;;  %2483 = vmatprep.mubr.bf16.mxu0 %v1522_v41  ;;  %v1313_v48 = vmul.f32 %v2664_v42, %v1305_v16  ;;  %2671 = vrcp.f32 %v1286_v32  ;;  %v1327_v52 = vadd.f32 %v2283_v26, %v1312_v3  ;;  %v2635_v16 = vld [vmem:[%s3592_s13 + $0x30] sm:$0xff]   ;;  %2511 = vmatprep.subr.bf16.mxu0 %v2637_v36  ;;  %v2640_v3 = vld [vmem:[%s3594_s15 + $0x18] sm:$0xff]   ;;  %v2642_v32 = vld [vmem:[%s3594_s15 + $0x28] sm:$0xff]  }
 0x251   : > { %v1277_v46 = vsel %vm1276_vm0, %v3217_v28, %v1275_v39  ;;  %v1157_v14 = vmul.f32 %v1144_v62, %v3183_v35  ;;  %v2666_v49 = vpop.eup %2665  ;;  %2673 = vrcp.f32 %v1287_v45  ;;  %v1307_v40 = vmul.f32 %v3205_v59, %v3075_v30  ;;  %v2638_v39 = vld [vmem:[%s3594_s15 + $0x8] sm:$0xff]   ;;  %2512 = vmatpush3.bf16.msra.mxu0 %v2637_v36  ;;  %v2639_v41 = vld [vmem:[%s3594_s15 + $0x10] sm:$0xff]  }
 0x252   : > { %v1280_v50 = vsel %vm1278_vm1, %v1279_v19, %v1277_v46  ;;  %v1328_v55 = vadd.f32 %v2283_v26, %v1313_v48  ;;  %v1314_v35 = vmul.f32 %v2666_v49, %v1306_v58  ;;  %v1310_v30 = vmul.f32 %v3205_v59, %v3082_v37  ;;  %v2629_v37 = vld [vmem:[%s3592_s13] sm:$0xff]   ;;  %v2631_v59 = vld [vmem:[%s3592_s13 + $0x10] sm:$0xff]   ;;  %2513 = vmatprep.subr.bf16.mxu0 %v2638_v39 }
 0x253   : > { %v1523_v51 = vpack.c.bf16 %v1158_v47, %v1157_v14  ;;  %v1288_v56 = vadd.f32 1e-06, %v1280_v50  ;;  %2487 = vmatprep.subr.bf16.mxu1 %v2629_v37  ;;  %v1357_v42 = vlaneseq  ;;  %v1355_v14 = vld [vmem:[%s3589_s10] sm:$0x3] }
 0x254   : > { %v1335_v60 = vpack.c.bf16 %v1328_v55, %v1327_v52  ;;  %v1329_v57 = vadd.f32 %v2283_v26, %v1314_v35 }
 0x255   : > { %2675 = vrcp.f32 %v1288_v56  ;;  %2484 = vmatmul.mubr.bf16.gmra.mrb[12].mxu0 %v1523_v51  ;;  %v1358_v19 = vshrl.u32 %v1357_v42, 7  ;;  %v3340_v56 = vld [vmem:[%s3591_s12] ss:$0 sm:$0xff] }
 0x256   : > { %v2668_v28 = vpop.eup %2667  ;;  %1480 = vmatmul.mubr.bf16.vlgmr.msra.gmra.mrb[16].mxu1 %v1335_v60  ;;  %2514 = vmatpush3.bf16.msra.mxu0 %v2638_v39 }
 0x257   : > { %v2670_v4 = vpop.eup %2669  ;;  %1489 = vmatprep.mubr.bf16.mxu1 %v2805_v2  ;;  %v1315_v7 = vmul.f32 %v2668_v28, %v1307_v40  ;;  %2488 = vmatpush3.bf16.msra.mxu1 %v2629_v37  ;;  %v1359_v46 = vsub.s32 0, %v1358_v19  ;;  %v1363_v48 = vsub.s32 1, %v1358_v19 }
 0x258   : > { %v1316_v13 = vmul.f32 %v2670_v4, %v1308_v12  ;;  %2489 = vmatprep.subr.bf16.mxu1 %v2630_v43  ;;  %2515 = vmatprep.subr.bf16.mxu0 %v2639_v41 }
 0x259   : > { %v1330_v8 = vadd.f32 %v2283_v26, %v1315_v7  ;;  %v3331_v49 = vrot.slane %v1355_v14, %v1359_v46  ;;  %v3333_v50 = vrot.slane %v1355_v14, %v1363_v48 }
 0x25a   : > { %v2672_v15 = vpop.eup %2671  ;;  %v1331_v20 = vadd.f32 %v2283_v26, %v1316_v13  ;;  %2516 = vmatpush3.bf16.msra.mxu0 %v2639_v41 }
 0x25b   : > { %v1336_v17 = vpack.c.bf16 %v1330_v8, %v1329_v57  ;;  %v1317_v18 = vmul.f32 %v2672_v15, %v1309_v22  ;;  %v2674_v21 = vpop.eup %2673  ;;  %2490 = vmatpush3.bf16.msra.mxu1 %v2630_v43  ;;  %2517 = vmatprep.subr.bf16.mxu0 %v2640_v3 }
 0x25c   : > { %v1318_v53 = vmul.f32 %v2674_v21, %v1310_v30  ;;  %2491 = vmatprep.subr.bf16.mxu1 %v2631_v59 }
 0x25d   : > { %v1332_v29 = vadd.f32 %v2283_v26, %v1317_v18 }
 0x25e   : > { %1490 = vmatmul.mubr.bf16.gmra.mrb[20].mxu1 %v1336_v17  ;;  %v1333_v54 = vadd.f32 %v2283_v26, %v1318_v53  ;;  %2518 = vmatpush3.bf16.msra.mxu0 %v2640_v3 }
 0x25f   : > { %v2676_v63 = vpop.eup %2675  ;;  %1499 = vmatprep.mubr.bf16.mxu1 %v2805_v2  ;;  %v1337_v38 = vpack.c.bf16 %v1332_v29, %v1331_v20  ;;  %2492 = vmatpush3.bf16.msra.mxu1 %v2631_v59 }
 0x260   : > { %v1319_v24 = vmul.f32 %v2676_v63, %v1311_v23 }
 0x262   : > { %v1334_v25 = vadd.f32 %v2283_v26, %v1319_v24  ;;  %v2641_v26 = vld [vmem:[%s3594_s15 + $0x20] sm:$0xff]  }
 0x263   : > { %2519 = vmatprep.subr.bf16.mxu0 %v2641_v26 }
 0x264   : > { %v1338_v27 = vpack.c.bf16 %v1334_v25, %v1333_v54  ;;  %2520 = vmatpush3.bf16.msra.mxu0 %v2641_v26 }
 0x265   : > { %2521 = vmatprep.subr.bf16.mxu0 %v2642_v32 }
 0x266   : > { %1500 = vmatmul.mubr.bf16.gmra.mrb[24].mxu1 %v1337_v38 }
 0x267   : > { %1509 = vmatprep.mubr.bf16.mxu1 %v2805_v2  ;;  %v2632_v2 = vld [vmem:[%s3592_s13 + $0x18] sm:$0xff]  }
 0x268   : > { %2493 = vmatprep.subr.bf16.mxu1 %v2632_v2  ;;  %2522 = vmatpush3.bf16.msra.mxu0 %v2642_v32 }
 0x269   : > { %2494 = vmatpush3.bf16.msra.mxu1 %v2632_v2 }
 0x26a   : > { %2495 = vmatprep.subr.bf16.mxu1 %v2633_v31 }
 0x26d   : > { %2496 = vmatpush3.bf16.msra.mxu1 %v2633_v31 }
 0x26e   : > { %1510 = vmatmul.mubr.bf16.gmra.mrb[28].mxu1 %v1338_v27  ;;  %2497 = vmatprep.subr.bf16.mxu1 %v2634_v33 }
 0x271   : > { %2498 = vmatpush3.bf16.msra.mxu1 %v2634_v33 }
 0x272   : > { %2499 = vmatprep.subr.bf16.mxu1 %v2635_v16 }
 0x275   : > { %2500 = vmatpush3.bf16.msra.mxu1 %v2635_v16 }
 0x276   : > { %2501 = vmatprep.subr.bf16.mxu1 %v2636_v34 }
 0x279   : > { %2502 = vmatpush3.bf16.msra.mxu1 %v2636_v34 }
 0x320   : > { %v2481_v44 = vpop.f32.mrb[8].mxu0 }
 0x321   : > { %v1629_v62 = vpop.f32.mrb[9].mxu0  ;;  %v3383_v43 = vadd.f32 %v2481_v44, %v3340_v56 }
 0x322   : > { %v2482_v45 = vpop.f32.mrb[10].mxu0  ;;  %v3356_v57 = vadd.f32 %v3340_v56, %v1629_v62 }
 0x323   : > { %v1632_v47 = vpop.f32.mrb[11].mxu0  ;;  %v3395_v3 = vadd.f32 %v2482_v45, %v3340_v56 }
 0x324   : > { %v3364_v13 = vadd.f32 %v3340_v56, %v1632_v47 }
 0x328   : > { %v2485_v51 = vpop.f32.mrb[12].mxu0 }
 0x329   : > { %v1481_v52 = vpop.f32.mrb[16].mxu1  ;;  %v3335_v55 = vpop.f32.mrb[13].mxu0  ;;  %v3398_v26 = vadd.f32 %v2485_v51, %v3340_v56 }
 0x32a   : > { %v3343_v58 = vadd.f32 %v1481_v52, %v3331_v49  ;;  %v1483_v60 = vpop.f32.mrb[17].mxu1  ;;  %v3345_v40 = vpop.f32.mrb[14].mxu0 }
 0x32b   : > { %v3348_v35 = vadd.f32 %v1483_v60, %v3333_v50  ;;  %v1485_v28 = vpop.f32.mrb[18].mxu1  ;;  %v3350_v4 = vpop.f32.mrb[15].mxu0 }
 0x32c   : > { %v3353_v7 = vadd.f32 %v1485_v28, %v3331_v49  ;;  %v1487_v12 = vpop.f32.mrb[19].mxu1 }
 0x32d   : > { %v1660_v8 = vmax.f32 %v3343_v58, %v3348_v35  ;;  %v3361_v22 = vadd.f32 %v1487_v12, %v3333_v50 }
 0x32f   : > { %v1668_v15 = vmax.f32 %v1660_v8, %v3356_v57  ;;  %v1661_v17 = vmax.f32 %v3353_v7, %v3361_v22 }
 0x331   : > { %v1676_v30 = vsub.f32 %v3343_v58, %v1668_v15  ;;  %v1700_v18 = vsub.f32 %v3348_v35, %v1668_v15  ;;  %v1724_v21 = vsub.f32 %v3356_v57, %v1668_v15  ;;  %v1669_v23 = vmax.f32 %v1661_v17, %v3364_v13  ;;  %v1491_v63 = vpop.f32.mrb[20].mxu1 }
 0x332   : > { %v3374_v20 = vadd.f32 %v1491_v63, %v3331_v49  ;;  %v1493_v29 = vpop.f32.mrb[21].mxu1 }
 0x333   : > { %v1684_v53 = vmul.f32 1.442695, %v1676_v30  ;;  %v1708_v24 = vmul.f32 1.442695, %v1700_v18  ;;  %v1677_v38 = vsub.f32 %v3353_v7, %v1669_v23  ;;  %v1701_v54 = vsub.f32 %v3361_v22, %v1669_v23  ;;  %v1495_v37 = vpop.f32.mrb[22].mxu1 }
 0x334   : > { %v1725_v25 = vsub.f32 %v3364_v13, %v1669_v23  ;;  %v3380_v27 = vadd.f32 %v1493_v29, %v3333_v50  ;;  %v3386_v2 = vadd.f32 %v1495_v37, %v3331_v49  ;;  %v1497_v31 = vpop.f32.mrb[23].mxu1  ;;  %v1732_v33 = vmul.f32 1.442695, %v1724_v21 }
 0x335   : > { %2677 = vpow2.f32 %v1684_v53  ;;  %v1686_v59 = vmul.f32 1.442695, %v1677_v38  ;;  %v1710_v16 = vmul.f32 1.442695, %v1701_v54  ;;  %v3391_v39 = vadd.f32 %v1497_v31, %v3333_v50 }
 0x336   : > { %2679 = vpow2.f32 %v1708_v24  ;;  %v1662_v34 = vmax.f32 %v3374_v20, %v3380_v27  ;;  %v1734_v36 = vmul.f32 1.442695, %v1725_v25  ;;  %v3422_v18 = vadd.f32 %v3340_v56, %v3335_v55 }
 0x337   : > { %2681 = vpow2.f32 %v1686_v59  ;;  %v1663_v32 = vmax.f32 %v3386_v2, %v3391_v39  ;;  %v3426_v21 = vadd.f32 %v3345_v40, %v3340_v56  ;;  %v3440_v59 = vadd.f32 %v3340_v56, %v3350_v4 }
 0x338   : > { %v1670_v41 = vmax.f32 %v1662_v34, %v3383_v43  ;;  %2683 = vpow2.f32 %v1710_v16 }
 0x339   : > { %v1501_v42 = vpop.f32.mrb[24].mxu1  ;;  %2685 = vpow2.f32 %v1732_v33  ;;  %v1671_v45 = vmax.f32 %v1663_v32, %v3395_v3 }
 0x33a   : > { %v1678_v19 = vsub.f32 %v3374_v20, %v1670_v41  ;;  %v1702_v44 = vsub.f32 %v3380_v27, %v1670_v41  ;;  %v1726_v62 = vsub.f32 %v3383_v43, %v1670_v41  ;;  %v1503_v46 = vpop.f32.mrb[25].mxu1  ;;  %2687 = vpow2.f32 %v1734_v36 }
 0x33b   : > { %v3407_v47 = vadd.f32 %v1501_v42, %v3331_v49  ;;  %v3410_v14 = vadd.f32 %v1503_v46, %v3333_v50  ;;  %v1505_v48 = vpop.f32.mrb[26].mxu1  ;;  %v1679_v12 = vsub.f32 %v3386_v2, %v1671_v45  ;;  %v1703_v8 = vsub.f32 %v3391_v39, %v1671_v45 }
 0x33c   : > { %v1688_v51 = vmul.f32 1.442695, %v1678_v19  ;;  %v1712_v52 = vmul.f32 1.442695, %v1702_v44  ;;  %v1736_v60 = vmul.f32 1.442695, %v1726_v62  ;;  %v3413_v28 = vadd.f32 %v1505_v48, %v3331_v49 }
 0x33d   : > { %v1727_v15 = vsub.f32 %v3395_v3, %v1671_v45  ;;  %v1664_v17 = vmax.f32 %v3407_v47, %v3410_v14  ;;  %v1507_v30 = vpop.f32.mrb[27].mxu1  ;;  %v1690_v29 = vmul.f32 1.442695, %v1679_v12  ;;  %v1714_v53 = vmul.f32 1.442695, %v1703_v8 }
 0x33e   : > { %2689 = vpow2.f32 %v1688_v51  ;;  %v3429_v23 = vadd.f32 %v1507_v30, %v3333_v50 }
 0x33f   : > { %v2678_v63 = vpop.eup %2677  ;;  %2691 = vpow2.f32 %v1712_v52  ;;  %v1738_v24 = vmul.f32 1.442695, %v1727_v15  ;;  %v1672_v55 = vmax.f32 %v1664_v17, %v3422_v18 }
 0x340   : > { %v2680_v38 = vpop.eup %2679  ;;  %v1748_v54 = vmul.f32 %v2678_v63, %v3343_v58  ;;  %2693 = vpow2.f32 %v1736_v60  ;;  %v1665_v25 = vmax.f32 %v3413_v28, %v3429_v23 }
 0x341   : > { %v1756_v40 = vmul.f32 %v2680_v38, %v3348_v35  ;;  %v3436_v37 = vadd.f32 %v2680_v38, %v2678_v63  ;;  %2695 = vpow2.f32 %v1690_v29  ;;  %v1511_v31 = vpop.f32.mrb[28].mxu1  ;;  %v2682_v33 = vpop.eup %2681  ;;  %v1680_v58 = vsub.f32 %v3407_v47, %v1672_v55 }
 0x342   : > { %2697 = vpow2.f32 %v1714_v53  ;;  %v1704_v16 = vsub.f32 %v3410_v14, %v1672_v55  ;;  %v1728_v34 = vsub.f32 %v3422_v18, %v1672_v55  ;;  %v1513_v36 = vpop.f32.mrb[29].mxu1  ;;  %v2684_v41 = vpop.eup %2683  ;;  %v1749_v35 = vmul.f32 %v2682_v33, %v3353_v7 }
 0x343   : > { %v1764_v32 = vadd.f32 %v1756_v40, %v1748_v54  ;;  %2699 = vpow2.f32 %v1738_v24  ;;  %v1673_v42 = vmax.f32 %v1665_v25, %v3440_v59  ;;  %v1515_v56 = vpop.f32.mrb[30].mxu1  ;;  %v2686_v4 = vpop.eup %2685  ;;  %v1757_v19 = vmul.f32 %v2684_v41, %v3361_v22 }
 0x344   : > { %v3448_v44 = vadd.f32 %v2684_v41, %v2682_v33  ;;  %v1692_v62 = vmul.f32 1.442695, %v1680_v58  ;;  %v1716_v46 = vmul.f32 1.442695, %v1704_v16  ;;  %v1517_v45 = vpop.f32.mrb[31].mxu1  ;;  %v2688_v48 = vpop.eup %2687  ;;  %v3454_v8 = vadd.f32 %v1511_v31, %v3331_v49 }
 0x345   : > { %v1740_v51 = vmul.f32 1.442695, %v1728_v34  ;;  %v1681_v52 = vsub.f32 %v3413_v28, %v1673_v42  ;;  %v1705_v60 = vsub.f32 %v3429_v23, %v1673_v42  ;;  %v1729_v7 = vsub.f32 %v3440_v59, %v1673_v42 }
 0x346   : > { %v1765_v12 = vadd.f32 %v1757_v19, %v1749_v35  ;;  %2701 = vpow2.f32 %v1692_v62  ;;  %v3457_v22 = vadd.f32 %v1513_v36, %v3333_v50  ;;  %v3462_v53 = vadd.f32 %v1515_v56, %v3331_v49 }
 0x347   : > { %2703 = vpow2.f32 %v1716_v46  ;;  %v1694_v15 = vmul.f32 1.442695, %v1681_v52  ;;  %v1718_v17 = vmul.f32 1.442695, %v1705_v60  ;;  %v1742_v30 = vmul.f32 1.442695, %v1729_v7 }
 0x348   : > { %v2690_v63 = vpop.eup %2689  ;;  %2705 = vpow2.f32 %v1740_v51  ;;  %v1666_v29 = vmax.f32 %v3454_v8, %v3457_v22  ;;  %v3465_v24 = vadd.f32 %v1517_v45, %v3333_v50  ;;  %v1772_v55 = vmul.f32 %v2686_v4, %v3356_v57 }
 0x349   : > { %v2692_v38 = vpop.eup %2691  ;;  %v1750_v54 = vmul.f32 %v2690_v63, %v3374_v20  ;;  %2707 = vpow2.f32 %v1694_v15  ;;  %v1773_v25 = vmul.f32 %v2688_v48, %v3364_v13 }
 0x34a   : > { %v2694_v40 = vpop.eup %2693  ;;  %v1758_v31 = vmul.f32 %v2692_v38, %v3380_v27  ;;  %v1790_v33 = vadd.f32 %v2692_v38, %v2690_v63  ;;  %2709 = vpow2.f32 %v1718_v17  ;;  %v1674_v58 = vmax.f32 %v1666_v29, %v3398_v26 }
 0x34b   : > { %v2696_v49 = vpop.eup %2695  ;;  %v1774_v16 = vmul.f32 %v2694_v40, %v3383_v43  ;;  %2711 = vpow2.f32 %v1742_v30  ;;  %v1667_v50 = vmax.f32 %v3462_v53, %v3465_v24  ;;  %v3475_v20 = vadd.f32 %v1772_v55, %v1764_v32 }
 0x34c   : > { %v2698_v34 = vpop.eup %2697  ;;  %v1766_v57 = vadd.f32 %v1758_v31, %v1750_v54  ;;  %v1798_v36 = vadd.f32 %v2694_v40, %v1790_v33  ;;  %v1751_v13 = vmul.f32 %v2696_v49, %v3386_v2  ;;  %v1682_v27 = vsub.f32 %v3454_v8, %v1674_v58 }
 0x34d   : > { %v2700_v41 = vpop.eup %2699  ;;  %v1759_v35 = vmul.f32 %v2698_v34, %v3391_v39  ;;  %v1791_v42 = vadd.f32 %v2698_v34, %v2696_v49  ;;  %v1706_v56 = vsub.f32 %v3457_v22, %v1674_v58  ;;  %v1730_v43 = vsub.f32 %v3398_v26, %v1674_v58 }
 0x34e   : > { %v1782_v19 = vadd.f32 %v1774_v16, %v1766_v57  ;;  %2713 = vrcp.f32 %v1798_v36  ;;  %v1775_v32 = vmul.f32 %v2700_v41, %v3395_v3  ;;  %v1696_v62 = vmul.f32 1.442695, %v1682_v27 }
 0x34f   : > { %v1767_v46 = vadd.f32 %v1759_v35, %v1751_v13  ;;  %v1799_v45 = vadd.f32 %v2700_v41, %v1791_v42  ;;  %v1720_v51 = vmul.f32 1.442695, %v1706_v56  ;;  %v1744_v52 = vmul.f32 1.442695, %v1730_v43 }
 0x350   : > { %v2702_v2 = vpop.eup %2701  ;;  %2715 = vpow2.f32 %v1696_v62  ;;  %v1675_v60 = vmax.f32 %v1667_v50, %v3426_v21  ;;  %v3484_v7 = vadd.f32 %v1773_v25, %v1765_v12  ;;  %v1796_v39 = vadd.f32 %v2686_v4, %v3436_v37 }
 0x351   : > { %v2704_v15 = vpop.eup %2703  ;;  %v1783_v17 = vadd.f32 %v1775_v32, %v1767_v46  ;;  %2717 = vrcp.f32 %v1799_v45  ;;  %v1752_v30 = vmul.f32 %v2702_v2, %v3407_v47  ;;  %v1797_v3 = vadd.f32 %v2688_v48, %v3448_v44 }
 0x352   : > { %v2706_v63 = vpop.eup %2705  ;;  %v1760_v29 = vmul.f32 %v2704_v15, %v3410_v14  ;;  %v1792_v38 = vadd.f32 %v2704_v15, %v2702_v2  ;;  %2719 = vpow2.f32 %v1720_v51  ;;  %v1683_v54 = vsub.f32 %v3462_v53, %v1675_v60 }
 0x353   : > { %v2708_v55 = vpop.eup %2707  ;;  %2721 = vpow2.f32 %v1744_v52  ;;  %v1707_v12 = vsub.f32 %v3465_v24, %v1675_v60  ;;  %v1731_v37 = vsub.f32 %v3426_v21, %v1675_v60  ;;  %v1776_v4 = vmul.f32 %v2706_v63, %v3422_v18 }
 0x354   : > { %v2710_v25 = vpop.eup %2709  ;;  %v1768_v40 = vadd.f32 %v1760_v29, %v1752_v30  ;;  %v1753_v47 = vmul.f32 %v2708_v55, %v3413_v28  ;;  %v1698_v44 = vmul.f32 1.442695, %v1683_v54  ;;  %2723 = vrcp.f32 %v1796_v39 }
 0x355   : > { %v2712_v48 = vpop.eup %2711  ;;  %v1761_v14 = vmul.f32 %v2710_v25, %v3429_v23  ;;  %v1793_v31 = vadd.f32 %v2710_v25, %v2708_v55  ;;  %v1722_v33 = vmul.f32 1.442695, %v1707_v12  ;;  %v1746_v58 = vmul.f32 1.442695, %v1731_v37  ;;  %v2644_v25 = vld [vmem:[%s3594_s15 + $0x38] sm:$0xff]  }
 0x356   : > { %2725 = vpow2.f32 %v1698_v44  ;;  %v1777_v49 = vmul.f32 %v2712_v48, %v3440_v59  ;;  %v1784_v16 = vadd.f32 %v1776_v4, %v1768_v40  ;;  %v1800_v50 = vadd.f32 %v2706_v63, %v1792_v38  ;;  %v2309_v40 = vld [vmem:[%s3593_s14] ss:$0 sm:$0xff] }
 0x357   : > { %v1769_v34 = vadd.f32 %v1761_v14, %v1753_v47  ;;  %2727 = vpow2.f32 %v1722_v33  ;;  %v1801_v18 = vadd.f32 %v2712_v48, %v1793_v31 }
 0x358   : > { %v2714_v57 = vpop.eup %2713  ;;  %2729 = vpow2.f32 %v1746_v58 }
 0x359   : > { %v1814_v36 = vmul.f32 %v2714_v57, %v1782_v19  ;;  %2731 = vrcp.f32 %v1797_v3  ;;  %v1785_v28 = vadd.f32 %v1777_v49, %v1769_v34 }
 0x35a   : > { %v2716_v13 = vpop.eup %2715  ;;  %2733 = vrcp.f32 %v1800_v50 }
 0x35b   : > { %v2718_v27 = vpop.eup %2717  ;;  %v1754_v23 = vmul.f32 %v2716_v13, %v3454_v8  ;;  %2735 = vrcp.f32 %v1801_v18 }
 0x35c   : > { %v2720_v41 = vpop.eup %2719  ;;  %v1815_v35 = vmul.f32 %v2718_v27, %v1783_v17 }
 0x35d   : > { %v2722_v42 = vpop.eup %2721  ;;  %v1762_v59 = vmul.f32 %v2720_v41, %v3457_v22  ;;  %v1794_v56 = vadd.f32 %v2720_v41, %v2716_v13 }
 0x35e   : > { %v2724_v43 = vpop.eup %2723  ;;  %v1821_v32 = vpack.c.bf16 %v1815_v35, %v1814_v36  ;;  %v1778_v62 = vmul.f32 %v2722_v42, %v3398_v26 }
 0x35f   : > { %v1770_v46 = vadd.f32 %v1762_v59, %v1754_v23  ;;  %v1812_v19 = vmul.f32 %v2724_v43, %v3475_v20  ;;  %v1802_v45 = vadd.f32 %v2722_v42, %v1794_v56 }
 0x360   : > { %v2726_v51 = vpop.eup %2725 }
 0x361   : > { %v2728_v52 = vpop.eup %2727  ;;  %v1755_v2 = vmul.f32 %v2726_v51, %v3462_v53  ;;  %v1786_v8 = vadd.f32 %v1778_v62, %v1770_v46  ;;  %2737 = vrcp.f32 %v1802_v45 }
 0x362   : > { %v2730_v60 = vpop.eup %2729  ;;  %v1763_v39 = vmul.f32 %v2728_v52, %v3465_v24  ;;  %v1795_v15 = vadd.f32 %v2728_v52, %v2726_v51 }
 0x363   : > { %v2732_v22 = vpop.eup %2731  ;;  %v1779_v17 = vmul.f32 %v2730_v60, %v3426_v21 }
 0x364   : > { %v2734_v30 = vpop.eup %2733  ;;  %v1771_v3 = vadd.f32 %v1763_v39, %v1755_v2  ;;  %v1813_v26 = vmul.f32 %v2732_v22, %v3484_v7  ;;  %v1803_v63 = vadd.f32 %v2730_v60, %v1795_v15  ;;  %v2643_v7 = vld [vmem:[%s3594_s15 + $0x30] sm:$0xff]  }
 0x365   : > { %v2736_v20 = vpop.eup %2735  ;;  %v1816_v29 = vmul.f32 %v2734_v30, %v1784_v16  ;;  %2523 = vmatprep.subr.bf16.mxu0 %v2643_v7 }
 0x366   : > { %v1820_v38 = vpack.c.bf16 %v1813_v26, %v1812_v19  ;;  %v1817_v54 = vmul.f32 %v2736_v20, %v1785_v28  ;;  %v1787_v55 = vadd.f32 %v1779_v17, %v1771_v3  ;;  %2739 = vrcp.f32 %v1803_v63  ;;  %2524 = vmatpush3.bf16.msra.mxu0 %v2643_v7 }
 0x367   : > { %2525 = vmatprep.subr.bf16.mxu0 %v2644_v25 }
 0x368   : > { %2503 = vmatprep.mubr.bf16.mxu1 %v1820_v38  ;;  %v1822_v53 = vpack.c.bf16 %v1817_v54, %v1816_v29 }
 0x369   : > { %2504 = vmatmul.mubr.bf16.vlgmr.msra.gmra.mrb[32].mxu1 %v1821_v32  ;;  %v2318_v32 = vld [vmem:[%s3595_s16] ss:$0 sm:$0xff] }
 0x36a   : > { %2507 = vmatprep.mubr.bf16.mxu1 %v1822_v53  ;;  %2526 = vmatpush3.bf16.msra.mxu0 %v2644_v25 }
 0x36b   : > { %v2738_v24 = vpop.eup %2737 }
 0x36c   : > { %v1818_v12 = vmul.f32 %v2738_v24, %v1786_v8 }
 0x370   : > { %v2740_v37 = vpop.eup %2739 }
 0x371   : > { %v1819_v4 = vmul.f32 %v2740_v37, %v1787_v55 }
 0x373   : > { %v1823_v21 = vpack.c.bf16 %v1819_v4, %v1818_v12 }
 0x375   : > { %2508 = vmatmul.mubr.bf16.gmra.mrb[36].mxu1 %v1823_v21 }
 0x43c   : > { %v2505_v47 = vpop.f32.mrb[32].mxu1 }
 0x43d   : > { %v1938_v44 = vadd.f32 %v2505_v47, %v2309_v40  ;;  %v1929_v48 = vpop.f32.mrb[33].mxu1 }
 0x43e   : > { %v1930_v14 = vadd.f32 %v2309_v40, %v1929_v48  ;;  %v2506_v31 = vpop.f32.mrb[34].mxu1 }
 0x43f   : > { %v1941_v33 = vadd.f32 %v2506_v31, %v2309_v40  ;;  %v1932_v58 = vpop.f32.mrb[35].mxu1  ;;  %v1962_v16 = vadd.f32 %v1938_v44, %v3034_v1 }
 0x440   : > { %v1933_v49 = vadd.f32 %v2309_v40, %v1932_v58  ;;  %v1960_v34 = vadd.f32 %v1930_v14, %v3029_v61 }
 0x441   : > { %v1963_v50 = vadd.f32 %v1941_v33, %v3038_v5 }
 0x442   : > { %v1961_v18 = vadd.f32 %v1933_v49, %v3031_v0 }
 0x443   : > { %v1969_v57 = vpack.c.bf16 %v1963_v50, %v1962_v16 }
 0x444   : > { %v1968_v36 = vpack.c.bf16 %v1961_v18, %v1960_v34 }
 0x446   : > { %2527 = vmatprep.mubr.bf16.mxu0 %v1968_v36 }
 0x447   : > { %2528 = vmatmul.mubr.bf16.vlgmr.msra.gmra.mrb[16].mxu0 %v1969_v57 }
 0x448   : > { %v2509_v28 = vpop.f32.mrb[36].mxu1 }
 0x449   : > { %v1954_v13 = vadd.f32 %v2509_v28, %v2309_v40  ;;  %v1945_v27 = vpop.f32.mrb[37].mxu1 }
 0x44a   : > { %v1946_v23 = vadd.f32 %v2309_v40, %v1945_v27  ;;  %v2510_v41 = vpop.f32.mrb[38].mxu1 }
 0x44b   : > { %v1957_v35 = vadd.f32 %v2510_v41, %v2309_v40  ;;  %v1948_v42 = vpop.f32.mrb[39].mxu1  ;;  %v1966_v5 = vadd.f32 %v1954_v13, %v3042_v9 }
 0x44c   : > { %v1949_v1 = vadd.f32 %v2309_v40, %v1948_v42  ;;  %v1964_v0 = vadd.f32 %v1946_v23, %v3040_v6 }
 0x44d   : > { %v1967_v61 = vadd.f32 %v1957_v35, %v3048_v11 }
 0x44e   : > { %v1965_v59 = vadd.f32 %v1949_v1, %v3046_v10 }
 0x44f   : > { %v1971_v56 = vpack.c.bf16 %v1967_v61, %v1966_v5 }
 0x450   : > { %v1970_v43 = vpack.c.bf16 %v1965_v59, %v1964_v0 }
 0x452   : > { %2531 = vmatprep.mubr.bf16.mxu0 %v1970_v43 }
 0x453   : > { %2532 = vmatmul.mubr.bf16.gmra.mrb[20].mxu0 %v1971_v56 }
 0x51a   : > { %v2529_v62 = vpop.f32.mrb[16].mxu0 }
 0x51b   : > { %v2086_v9 = vadd.f32 %v2529_v62, %v2318_v32  ;;  %v2077_v46 = vpop.f32.mrb[17].mxu0 }
 0x51c   : > { %v2078_v11 = vadd.f32 %v2318_v32, %v2077_v46  ;;  %v2530_v19 = vpop.f32.mrb[18].mxu0 }
 0x51d   : > { %2110 = vst [vmem:[%s616_s21 + $0x10] sm:$0xff] %v2086_v9  ;;  %v2089_v6 = vadd.f32 %v2530_v19, %v2318_v32  ;;  %v2080_v10 = vpop.f32.mrb[19].mxu0 }
 0x51e   : > { %2108 = vst [vmem:[%s616_s21] sm:$0xff] %v2078_v11  ;;  %v2081_v45 = vadd.f32 %v2318_v32, %v2080_v10 }
 0x51f   : > { %2111 = vst [vmem:[%s616_s21 + $0x18] sm:$0xff] %v2089_v6 }
 0x520   : > { %2109 = vst [vmem:[%s616_s21 + $0x8] sm:$0xff] %v2081_v45 }
 0x526   : > { %v2533_v51 = vpop.f32.mrb[20].mxu0 }
 0x527   : > { %v2102_v52 = vadd.f32 %v2533_v51, %v2318_v32  ;;  %v2093_v2 = vpop.f32.mrb[21].mxu0 }
 0x528   : > { %v2094_v8 = vadd.f32 %v2318_v32, %v2093_v2  ;;  %v2534_v60 = vpop.f32.mrb[22].mxu0 }
 0x529   : > { %2114 = vst [vmem:[%s616_s21 + $0x30] sm:$0xff] %v2102_v52  ;;  %v2105_v39 = vadd.f32 %v2534_v60, %v2318_v32  ;;  %v2096_v15 = vpop.f32.mrb[23].mxu0 }
 0x52a   : > { %2112 = vst [vmem:[%s616_s21 + $0x20] sm:$0xff] %v2094_v8  ;;  %v2097_v22 = vadd.f32 %v2318_v32, %v2096_v15 }
 0x52b   : > { %2115 = vst [vmem:[%s616_s21 + $0x38] sm:$0xff] %v2105_v39 }
 0x52c   : > { %2113 = vst [vmem:[%s616_s21 + $0x28] sm:$0xff] %v2097_v22 }
 0x52d   : > { %2754 = shalt.err (!%p2751_p3)
}
 0x52e   : > { %s2755_s26 = scalar_lea.hbm %s3532_s24, 1024  ;;  %s2759_s17 = scalar_lea.hbm %s3621_s18, 4096 }
 0x52f   : > { %p2756_p4 = scmp.ne.s32.totalorder %s3532_s24, %s2755_s26  ;;  %p2760_p9 = scmp.lt.u32.totalorder %s3532_s24, %s3621_s18 }
 0x530   : > { %p2761_p10 = scmp.lt.u32.totalorder %s2759_s17, %s2755_s26  ;;  %p2763_p12 = scmp.lt.u32.totalorder %s2755_s26, %s3532_s24 }
 0x531   : > { %p2757_p7 = pnand %p2756_p4, %p2939_p5 }
 0x532   : > { %p2762_p11 = por %p2761_p10, %p2760_p9 }
 0x533   : > { %p2758_p8 = pneg %p2757_p7 }
 0x534   : > { %p2764_p13 = por %p2763_p12, %p2762_p11 }
 0x536   : > { %p2765_p0 = pnand %p2764_p13, %p2758_p8 }
 0x538   : > { %2768 = shalt.err (!%p2765_p0)
}
 0x539   : > { %s2809_s19 = smov 128   ;;  %s2810_s30 = smov 8  }
 0x53a   : > { %2535 = dma.vmem_to_hbm [thread:$0]  (%p2939_p5), %s3534_s1, 1024, %s3532_s24, %s3538_s28, %s2809_s19, %s2809_s19, %s2810_s30  }
 0x53b PF: > { %s3622_s22 = sld [smem:[#allocation7_spill]]  ;;  %s3623_s0 = sld [smem:[#allocation5_spill]] }
 0x541   : > { %p2541_p1 = scmp.ge.s32.totalorder %s3622_s22, 2  ;;  %s2146_s21 = sand.u32 1, %s3623_s0  }
 0x542   : > { %s2147_s26 = scalar_lea.sflag [#allocation3], %s2146_s21 }
 0x543   : > { %p2538_p2 = pnand %p2541_p1, %p2943_p6 }
 0x545   : > { %2786 = dma.done.wait (!%p2538_p2), %s2147_s26, 1024  }
 0x546   : > { %2788 = vsyncadd (!%p2538_p2), %s2147_s26, 4294966272  ;;  %s3625_s27 = sld [smem:[#allocation8_spill]]  ;;  %s3626_s17 = sld [smem:[#allocation6_spill]] }
 0x547   : > { %s3627_s26 = sld [smem:[#allocation9_spill]]  ;;  %s3628_s24 = smov %s2795_s25 }
 0x54c   : > { %p27_p3 = scmp.ge.s32.totalorder %s3625_s27, 6   ;;  %s3629_s25 = smov %s3626_s17 }
 0x54e   :  { %29 = sbr.rel (!%p27_p3) target bundleno = 7 (0x7), region = 135 }
 0x555   :  { %2152 = vsyncpa [#allocation3], 1 }
 0x556   :  { %2154 = vsyncpa [#allocation3 + $0x1], 1 }

</bundles_post_ra>
